<compile_context>
chip_gen: v7x
topology: tpu7x:2x2x1
jax: 0.10.0
libtpu: 0.0.40
codegen_flags: <defaults>
</compile_context>

<pallas_src>
import functools
import math

import jax
import jax.numpy as jnp
from jax.experimental import pallas as pl
from jax.experimental.pallas import tpu as pltpu

_EPS = 1e-5
_ROUTER_PAD = 128   # router logits padded to a full lane register
_NEG_INF = -1e30


# ----------------------------------------------------------------------------
# Tiling / compiler-params helpers
# ----------------------------------------------------------------------------
def _token_tile(n, requested=None):
    """Token-tile size that divides n (second-to-last dim stays 8-aligned)."""
    if requested is not None:
        assert n % requested == 0, "token_tile must divide the number of tokens"
        return requested
    for t in (512, 256, 128, 64, 32, 16, 8):
        if t <= n and n % t == 0:
            return t
    return n


def _col_tile(n, requested=None):
    """Output-feature tile for streaming a (D, Dout) weight."""
    if requested is not None:
        assert n % requested == 0
        return requested
    if n <= 1024:
        return n
    for t in (512, 256, 128):
        if n % t == 0:
            return t
    return n


def _ff_tile(f, requested=None):
    """d_ff tile for streaming w1 column-tiles / w2 row-tiles in the MoE kernel."""
    if requested is not None:
        assert f % requested == 0
        return requested
    if f <= 1024:
        return f
    for t in (1024, 512, 256):
        if f % t == 0:
            return t
    return f


def _vmem_limit(*specs):
    """Scoped-VMEM budget from (shape, dtype) of the blocks resident per step."""
    total = 0
    for shape, dtype in specs:
        total += math.prod(shape) * jnp.dtype(dtype).itemsize
    # 2x for double-buffered pipelining + margin for in-kernel temporaries.
    return max(2 * total + (8 << 20), 32 << 20)


def _cparams(dims, *vmem_specs):
    return pltpu.CompilerParams(dimension_semantics=dims,
                                vmem_limit_bytes=_vmem_limit(*vmem_specs))


# ----------------------------------------------------------------------------
# Pallas kernels
# ----------------------------------------------------------------------------
def _layernorm_kernel(x_ref, g_ref, b_ref, o_ref):
    x = x_ref[...].astype(jnp.float32)
    mean = jnp.mean(x, axis=-1, keepdims=True)
    var = jnp.mean(jnp.square(x - mean), axis=-1, keepdims=True)
    y = (x - mean) * jax.lax.rsqrt(var + _EPS)
    o_ref[...] = (y * g_ref[...] + b_ref[...]).astype(o_ref.dtype)


def _ln_matmul_kernel(x_ref, g_ref, b_ref, w_ref, bias_ref, o_ref):
    """Fused LayerNorm -> (x W + b) for one (token, out-column) tile.

    LN statistics in f32, matmul on the MXU with bf16 operands, f32 accumulate.
    """
    x = x_ref[...].astype(jnp.float32)
    mean = jnp.mean(x, axis=-1, keepdims=True)
    var = jnp.mean(jnp.square(x - mean), axis=-1, keepdims=True)
    z = (x - mean) * jax.lax.rsqrt(var + _EPS) * g_ref[...] + b_ref[...]
    y = jnp.dot(z.astype(jnp.bfloat16), w_ref[...],
                preferred_element_type=jnp.float32) + bias_ref[...]
    o_ref[...] = y.astype(o_ref.dtype)


def _attn_outproj_kernel(qkv_ref, mask_ref, wo_ref, bo_ref, res_ref, o_ref, *,
                         heads, scale):
    """Self-attention for one batch element (all heads) fused with the
    head-merge, out-projection and residual add.

    qkv block: [S, 3*D] in the standard packed layout; heads are static lane
    slices (no HBM head transposes).  Softmax stats and accumulation in f32.
    # TODO(synk): flash-style KV tiling for long S (scores are [S, S] per head).
    """
    S, D3 = qkv_ref.shape
    D = D3 // 3
    dh = D // heads
    mask = mask_ref[...].astype(jnp.float32)
    outs = []
    for h in range(heads):
        q = qkv_ref[:, h * dh:(h + 1) * dh].astype(jnp.bfloat16)
        k = qkv_ref[:, D + h * dh:D + (h + 1) * dh].astype(jnp.bfloat16)
        v = qkv_ref[:, 2 * D + h * dh:2 * D + (h + 1) * dh].astype(jnp.bfloat16)
        s = jax.lax.dot_general(q, k, (((1,), (1,)), ((), ())),
                                preferred_element_type=jnp.float32)
        s = s * scale + mask
        m = jnp.max(s, axis=-1, keepdims=True)
        p = jnp.exp(s - m)
        p = p / jnp.sum(p, axis=-1, keepdims=True)   # exact division (parity)
        outs.append(jnp.dot(p.astype(jnp.bfloat16), v,
                            preferred_element_type=jnp.float32))
    o = jnp.concatenate(outs, axis=-1)               # [S, D] head-merge in-register
    y = jnp.dot(o.astype(jnp.bfloat16), wo_ref[...],
                preferred_element_type=jnp.float32) + bo_ref[...]
    o_ref[...] = (res_ref[...].astype(jnp.float32) + y).astype(o_ref.dtype)


def _moe_kernel(x_ref, g_ref, b_ref, wr_ref, br_ref, w1_ref, b1_ref, w2_ref, b2_ref,
                out_ref, counts_ref, psum_ref, pmax_ref,
                z_sc, pmax_sc, acc_sc):
    """Fused LayerNorm -> router softmax -> shared-expert FFN -> scale -> +residual.

    Grid axes: (token tile i [parallel], d_ff tile j [arbitrary]).
    Router / routing statistics are computed once per token tile (j == 0) and
    emitted as per-tile partial outputs (lane-padded to 128), so the token axis
    is safe to shard across TensorCores.  The FFN streams w1/w2 over d_ff tiles
    into a (tm, D) f32 accumulator scratch.
    """
    j = pl.program_id(1)

    @pl.when(j == 0)
    def _router_and_init():
        x = x_ref[...].astype(jnp.float32)
        mean = jnp.mean(x, axis=-1, keepdims=True)
        var = jnp.mean(jnp.square(x - mean), axis=-1, keepdims=True)
        z = (x - mean) * jax.lax.rsqrt(var + _EPS) * g_ref[...] + b_ref[...]
        zb = z.astype(jnp.bfloat16)
        z_sc[...] = zb

        # Router softmax over lane-padded experts (padded logits = -1e30 -> p=0).
        logits = jnp.dot(zb, wr_ref[...],
                         preferred_element_type=jnp.float32) + br_ref[...]
        m = jnp.max(logits, axis=-1, keepdims=True)
        e = jnp.exp(logits - m)
        rp = e / jnp.sum(e, axis=-1, keepdims=True)          # [tm, EPAD]
        pmax = jnp.max(rp, axis=-1, keepdims=True)           # [tm, 1]
        lane = jax.lax.broadcasted_iota(jnp.int32, rp.shape, 1)
        # first index achieving the max (== torch.max index for distinct values)
        routes = jnp.min(jnp.where(rp >= pmax, lane, rp.shape[-1]),
                         axis=-1, keepdims=True)
        one_hot = (lane == routes).astype(jnp.float32)

        counts_ref[...] = jnp.sum(one_hot, axis=0, keepdims=True)[None]  # [1,1,EPAD]
        psum_ref[...] = jnp.sum(rp, axis=0, keepdims=True)[None]         # [1,1,EPAD]
        pmax_ref[...] = pmax
        pmax_sc[...] = pmax
        acc_sc[...] = jnp.zeros(acc_sc.shape, acc_sc.dtype)

    # Expert FFN (all experts share weights): one d_ff tile per grid step.
    h = jnp.dot(z_sc[...], w1_ref[...],
                preferred_element_type=jnp.float32) + b1_ref[...]
    h = jnp.maximum(h, 0.0)
    acc_sc[...] += jnp.dot(h.astype(jnp.bfloat16), w2_ref[...],
                           preferred_element_type=jnp.float32)

    @pl.when(j == pl.num_programs(1) - 1)
    def _finalize():
        y = acc_sc[...] + b2_ref[...]
        # is_scale_prob=True -> scale by chosen-expert probability; fuse residual.
        out_ref[...] = (x_ref[...].astype(jnp.float32)
                        + y * pmax_sc[...]).astype(out_ref.dtype)


# ----------------------------------------------------------------------------
# Pallas wrappers
# ----------------------------------------------------------------------------
def layernorm(x2d, gamma, beta, *, token_tile=None):
    N, D = x2d.shape
    tm = _token_tile(N, token_tile)
    cp = _cparams(("parallel",),
                  ((tm, D), jnp.float32), ((tm, D), x2d.dtype),
                  ((1, D), jnp.float32), ((1, D), jnp.float32))
    return pl.pallas_call(
        _layernorm_kernel,
        out_shape=jax.ShapeDtypeStruct((N, D), x2d.dtype),
        grid=(N // tm,),
        in_specs=[pl.BlockSpec((tm, D), lambda i: (i, 0)),
                  pl.BlockSpec((1, D), lambda i: (0, 0)),
                  pl.BlockSpec((1, D), lambda i: (0, 0))],
        out_specs=pl.BlockSpec((tm, D), lambda i: (i, 0)),
        compiler_params=cp,
    )(x2d, gamma.reshape(1, D), beta.reshape(1, D))


def ln_matmul(x2d, gamma, beta, w, bias, *, token_tile=None, col_tile=None):
    """Fused LayerNorm -> linear, weight streamed in output-column tiles."""
    N, D = x2d.shape
    Dout = w.shape[1]
    tm = _token_tile(N, token_tile)
    tn = _col_tile(Dout, col_tile)
    cp = _cparams(("parallel", "parallel"),
                  ((tm, D), jnp.float32), ((D, tn), w.dtype),
                  ((tm, tn), x2d.dtype), ((tm, tn), jnp.float32),
                  ((1, D), jnp.float32), ((1, D), jnp.float32),
                  ((1, tn), jnp.float32))
    return pl.pallas_call(
        _ln_matmul_kernel,
        out_shape=jax.ShapeDtypeStruct((N, Dout), x2d.dtype),
        grid=(N // tm, Dout // tn),
        in_specs=[pl.BlockSpec((tm, D), lambda i, j: (i, 0)),
                  pl.BlockSpec((1, D), lambda i, j: (0, 0)),
                  pl.BlockSpec((1, D), lambda i, j: (0, 0)),
                  pl.BlockSpec((D, tn), lambda i, j: (0, j)),
                  pl.BlockSpec((1, tn), lambda i, j: (0, j))],
        out_specs=pl.BlockSpec((tm, tn), lambda i, j: (i, j)),
        compiler_params=cp,
    )(x2d, gamma.reshape(1, D), beta.reshape(1, D), w, bias.reshape(1, Dout))


def attention_block(qkv, mask, wo, bo, res, *, seq_len, batch, heads):
    """Per-batch self-attention + head merge + out-projection + residual."""
    N, D3 = qkv.shape
    D = D3 // 3
    S = seq_len
    scale = 1.0 / math.sqrt(D // heads)
    kern = functools.partial(_attn_outproj_kernel, heads=heads, scale=scale)
    cp = _cparams(("parallel",),
                  ((S, D3), qkv.dtype), ((S, S), mask.dtype), ((D, D), wo.dtype),
                  ((1, D), jnp.float32), ((S, D), res.dtype), ((S, D), res.dtype),
                  ((heads, S, S), jnp.float32))   # headroom for score temporaries
    return pl.pallas_call(
        kern,
        out_shape=jax.ShapeDtypeStruct((N, D), res.dtype),
        grid=(batch,),
        in_specs=[pl.BlockSpec((S, D3), lambda b: (b, 0)),
                  pl.BlockSpec((S, S), lambda b: (0, 0)),
                  pl.BlockSpec((D, D), lambda b: (0, 0)),
                  pl.BlockSpec((1, D), lambda b: (0, 0)),
                  pl.BlockSpec((S, D), lambda b: (b, 0))],
        out_specs=pl.BlockSpec((S, D), lambda b: (b, 0)),
        compiler_params=cp,
    )(qkv, mask, wo, bo.reshape(1, D), res)


def switch_ffn(x2d, gamma, beta, wr_pad, br_pad, w1, b1, w2, b2, *,
               token_tile=None, ff_tile=None):
    N, D = x2d.shape
    EP = wr_pad.shape[1]
    F = w1.shape[1]
    tm = _token_tile(N, token_tile)
    ft = _ff_tile(F, ff_tile)
    ni, nj = N // tm, F // ft
    cp = _cparams(("parallel", "arbitrary"),
                  ((tm, D), jnp.float32), ((D, EP), wr_pad.dtype),
                  ((1, EP), jnp.float32), ((D, ft), w1.dtype),
                  ((1, ft), jnp.float32), ((ft, D), w2.dtype),
                  ((1, D), jnp.float32), ((tm, D), x2d.dtype),
                  ((1, 1, EP), jnp.float32), ((1, 1, EP), jnp.float32),
                  ((tm, 1), jnp.float32),
                  ((tm, D), jnp.bfloat16), ((tm, 1), jnp.float32),
                  ((tm, D), jnp.float32), ((tm, ft), jnp.float32),
                  ((1, D), jnp.float32), ((1, D), jnp.float32))
    return pl.pallas_call(
        _moe_kernel,
        out_shape=(jax.ShapeDtypeStruct((N, D), x2d.dtype),
                   jax.ShapeDtypeStruct((ni, 1, EP), jnp.float32),
                   jax.ShapeDtypeStruct((ni, 1, EP), jnp.float32),
                   jax.ShapeDtypeStruct((N, 1), jnp.float32)),
        grid=(ni, nj),
        in_specs=[pl.BlockSpec((tm, D), lambda i, j: (i, 0)),
                  pl.BlockSpec((1, D), lambda i, j: (0, 0)),
                  pl.BlockSpec((1, D), lambda i, j: (0, 0)),
                  pl.BlockSpec((D, EP), lambda i, j: (0, 0)),
                  pl.BlockSpec((1, EP), lambda i, j: (0, 0)),
                  pl.BlockSpec((D, ft), lambda i, j: (0, j)),
                  pl.BlockSpec((1, ft), lambda i, j: (0, j)),
                  pl.BlockSpec((ft, D), lambda i, j: (j, 0)),
                  pl.BlockSpec((1, D), lambda i, j: (0, 0))],
        out_specs=(pl.BlockSpec((tm, D), lambda i, j: (i, 0)),
                   pl.BlockSpec((1, 1, EP), lambda i, j: (i, 0, 0)),
                   pl.BlockSpec((1, 1, EP), lambda i, j: (i, 0, 0)),
                   pl.BlockSpec((tm, 1), lambda i, j: (i, 0))),
        scratch_shapes=[pltpu.VMEM((tm, D), jnp.bfloat16),   # LN output (bf16)
                        pltpu.VMEM((tm, 1), jnp.float32),    # route_prob_max
                        pltpu.VMEM((tm, D), jnp.float32)],   # FFN accumulator
        compiler_params=cp,
    )(x2d, gamma.reshape(1, D), beta.reshape(1, D), wr_pad, br_pad.reshape(1, EP),
      w1, b1.reshape(1, F), w2, b2.reshape(1, D))


# ----------------------------------------------------------------------------
# Model (glue in plain JAX; tokens kept in (batch, seq) order internally)
# ----------------------------------------------------------------------------
def switch_layer_forward(x2, mask, p, wr_pad, br_pad, *, seq_len, batch, heads,
                         n_experts, token_tile=None, ff_tile=None):
    # --- self-attention block: LN fused into the QKV projection ---
    qkv = ln_matmul(x2, p["ln_attn_g"], p["ln_attn_b"],
                    p["in_proj_w"], p["in_proj_b"], token_tile=token_tile)
    # attention + head-merge + out-projection + residual in one kernel
    x2 = attention_block(qkv, mask, p["out_proj_w"], p["out_proj_b"], x2,
                         seq_len=seq_len, batch=batch, heads=heads)

    # --- switch feed-forward block: LN + router + FFN + scale + residual ---
    x2, counts_p, psum_p, pmax = switch_ffn(
        x2, p["ln_ff_g"], p["ln_ff_b"], wr_pad, br_pad,
        p["ffn_w1"], p["ffn_b1"], p["ffn_w2"], p["ffn_b2"],
        token_tile=token_tile, ff_tile=ff_tile)
    counts = jnp.sum(counts_p, axis=(0, 1))[:n_experts]
    route_prob = jnp.sum(psum_p, axis=(0, 1))[:n_experts]
    # route_prob_max: internal (batch, seq) order -> reference (seq, batch) flatten
    pmax_sb = pmax[:, 0].reshape(batch, seq_len).T.reshape(-1)
    n_dropped = 0  # drop_tokens=False
    return x2, counts, route_prob, n_dropped, pmax_sb


@functools.partial(jax.jit,
                   static_argnames=("n_layers", "heads", "token_tile", "ff_tile"))
def switch_transformer_forward(x, mask, p, *, n_layers, heads,
                               token_tile=None, ff_tile=None):
    S, B, D = x.shape
    E = p["switch_w"].shape[1]
    EP = max(_ROUTER_PAD, pl.cdiv(E, _ROUTER_PAD) * _ROUTER_PAD)
    # Pad the tiny router to full 128 lanes once (weights shared across layers).
    wr_pad = jnp.pad(p["switch_w"], ((0, 0), (0, EP - E)))
    br_pad = jnp.pad(p["switch_b"].astype(jnp.float32), (0, EP - E),
                     constant_values=_NEG_INF)

    # Single layout change for the whole network: token-major (batch, seq) order.
    x2 = x.transpose(1, 0, 2).reshape(B * S, D)

    counts, route_prob, n_dropped, route_prob_max = [], [], [], []
    for _ in range(n_layers):  # same layer (shared weights), like the PyTorch module
        x2, f, rp, nd, pmax = switch_layer_forward(
            x2, mask, p, wr_pad, br_pad, seq_len=S, batch=B, heads=heads,
            n_experts=E, token_tile=token_tile, ff_tile=ff_tile)
        counts.append(f)
        route_prob.append(rp)
        n_dropped.append(nd)
        route_prob_max.append(pmax)

    x2 = layernorm(x2, p["final_ln_g"], p["final_ln_b"], token_tile=token_tile)
    xout = x2.reshape(B, S, D).transpose(1, 0, 2)
    return (xout, jnp.stack(counts), jnp.stack(route_prob), n_dropped,
            jnp.stack(route_prob_max))


# ----------------------------------------------------------------------------
# Parameter init + demo
# ----------------------------------------------------------------------------
def init_params(key, d_model, d_ff, heads, n_experts):
    ks = jax.random.split(key, 8)
    s = 0.05

    def w(k, shape):
        # Weights stored in bf16: MXU-native operand dtype, halves HBM/VMEM use.
        return (jax.random.normal(k, shape, dtype=jnp.float32) * s).astype(jnp.bfloat16)

    return {
        "ln_attn_g": jnp.ones((d_model,), jnp.float32),
        "ln_attn_b": jnp.zeros((d_model,), jnp.float32),
        "ln_ff_g": jnp.ones((d_model,), jnp.float32),
        "ln_ff_b": jnp.zeros((d_model,), jnp.float32),
        "in_proj_w": w(ks[0], (d_model, 3 * d_model)),
        "in_proj_b": jnp.zeros((3 * d_model,), jnp.float32),
        "out_proj_w": w(ks[1], (d_model, d_model)),
        "out_proj_b": jnp.zeros((d_model,), jnp.float32),
        "switch_w": w(ks[2], (d_model, n_experts)),
        "switch_b": jnp.zeros((n_experts,), jnp.float32),
        "ffn_w1": w(ks[3], (d_model, d_ff)),
        "ffn_b1": jnp.zeros((d_ff,), jnp.float32),
        "ffn_w2": w(ks[4], (d_ff, d_model)),
        "ffn_b2": jnp.zeros((d_model,), jnp.float32),
        "final_ln_g": jnp.ones((d_model,), jnp.float32),
        "final_ln_b": jnp.zeros((d_model,), jnp.float32),
    }


if __name__ == "__main__":
    seq_len, batch, d_model = 8, 2, 32
    heads, d_ff, n_experts, n_layers = 4, 256, 4, 2

    key = jax.random.PRNGKey(0)
    kx, kp = jax.random.split(key)
    x = jax.random.normal(kx, (seq_len, batch, d_model), dtype=jnp.float32)
    mask = jnp.zeros((seq_len, seq_len), dtype=jnp.float32)  # additive mask (no-op)
    params = init_params(kp, d_model, d_ff, heads, n_experts)

    # Default path: auto-selected tiles (single token/d_ff tile at this toy size).
    out, counts, route_prob, n_dropped, route_prob_max = switch_transformer_forward(
        x, mask, params, n_layers=n_layers, heads=heads)
    jax.block_until_ready(out)
    jax.block_until_ready(counts)
    jax.block_until_ready(route_prob)
    jax.block_until_ready(route_prob_max)

    assert out.shape == (seq_len, batch, d_model)
    assert counts.shape == (n_layers, n_experts)
    assert route_prob.shape == (n_layers, n_experts)
    assert route_prob_max.shape == (n_layers, seq_len * batch)
    assert len(n_dropped) == n_layers
    assert bool(jnp.all(jnp.isfinite(out)))
    # every token is routed to exactly one expert
    assert bool(jnp.all(jnp.abs(counts.sum(-1) - seq_len * batch) < 1e-3))

    # Multi-tile path (token grid > 1 and streamed d_ff tiles) must agree with
    # the single-tile path (exercises the cross-tile accumulator / partial-sum
    # reduction logic).
    out2, counts2, route_prob2, _, route_prob_max2 = switch_transformer_forward(
        x, mask, params, n_layers=n_layers, heads=heads, token_tile=8, ff_tile=128)
    jax.block_until_ready(out2)
    assert jnp.allclose(out, out2, atol=1e-4, rtol=1e-4)
    assert jnp.allclose(counts, counts2)
    assert jnp.allclose(route_prob, route_prob2, atol=1e-4, rtol=1e-4)
    assert jnp.allclose(route_prob_max, route_prob_max2, atol=1e-5, rtol=1e-5)

    print("KERNEL_OK")
</pallas_src>

<mosaic_0001>
module attributes {stable_mosaic.version = 11 : i64} {
  func.func @_attn_outproj_kernel(%arg0: i32, %arg1: memref<8x96xf32, #tpu.memory_space<vmem>>, %arg2: memref<8x8xf32, #tpu.memory_space<vmem>>, %arg3: memref<32x32xbf16, #tpu.memory_space<vmem>>, %arg4: memref<1x32xf32, #tpu.memory_space<vmem>>, %arg5: memref<8x32xf32, #tpu.memory_space<vmem>>, %arg6: memref<8x32xf32, #tpu.memory_space<vmem>>) attributes {dimension_semantics = [#tpu.dimension_semantics<parallel>], iteration_bounds = array<i64: 2>, scalar_prefetch = 0 : i64, scratch_operands = 0 : i64, tpu.core_type = #tpu.core_type<tc>, window_params = [{transform_indices = @transform_0, window_bounds = array<i64: 8, 96>}, {pipeline_mode = #tpu.pipeline_mode<synchronous>, transform_indices = @transform_1, window_bounds = array<i64: 8, 8>}, {pipeline_mode = #tpu.pipeline_mode<synchronous>, transform_indices = @transform_2, window_bounds = array<i64: 32, 32>}, {pipeline_mode = #tpu.pipeline_mode<synchronous>, transform_indices = @transform_3, window_bounds = array<i64: 1, 32>}, {transform_indices = @transform_4, window_bounds = array<i64: 8, 32>}, {transform_indices = @transform_5, window_bounds = array<i64: 8, 32>}]} {
    %c0 = arith.constant 0 : index
    %c0_0 = arith.constant 0 : index
    %0 = vector.load %arg2[%c0, %c0_0] : memref<8x8xf32, #tpu.memory_space<vmem>>, vector<8x8xf32>
    %c0_1 = arith.constant 0 : index
    %c0_2 = arith.constant 0 : index
    %1 = vector.load %arg1[%c0_1, %c0_2] : memref<8x96xf32, #tpu.memory_space<vmem>>, vector<8x8xf32>
    %2 = arith.truncf %1 : vector<8x8xf32> to vector<8x8xbf16>
    %c0_3 = arith.constant 0 : index
    %c32 = arith.constant 32 : index
    %3 = vector.load %arg1[%c0_3, %c32] : memref<8x96xf32, #tpu.memory_space<vmem>>, vector<8x8xf32>
    %4 = arith.truncf %3 : vector<8x8xf32> to vector<8x8xbf16>
    %c0_4 = arith.constant 0 : index
    %c64 = arith.constant 64 : index
    %5 = vector.load %arg1[%c0_4, %c64] : memref<8x96xf32, #tpu.memory_space<vmem>>, vector<8x8xf32>
    %6 = arith.truncf %5 : vector<8x8xf32> to vector<8x8xbf16>
    %cst = arith.constant dense<0.000000e+00> : vector<8x8xf32>
    %7 = tpu.matmul %2, %4, %cst {dimension_numbers = #tpu.dot_dimension_numbers<[1], [1], [0], [0], [0, 0, 1, 0], [], []>} : vector<8x8xbf16>, vector<8x8xbf16>, vector<8x8xf32> -> vector<8x8xf32>
    %cst_5 = arith.constant 0.353553385 : f32
    %8 = vector.broadcast %cst_5 : f32 to vector<8x8xf32>
    %9 = arith.mulf %7, %8 : vector<8x8xf32>
    %10 = arith.addf %9, %0 : vector<8x8xf32>
    %cst_6 = arith.constant dense<0xFF800000> : vector<8xf32>
    %11 = vector.multi_reduction <maximumf>, %10, %cst_6 [1] : vector<8x8xf32> to vector<8xf32>
    %12 = vector.shape_cast %11 : vector<8xf32> to vector<8x1xf32>
    %13 = vector.broadcast %12 : vector<8x1xf32> to vector<8x8xf32>
    %14 = arith.subf %10, %13 : vector<8x8xf32>
    %15 = math.exp %14 : vector<8x8xf32>
    %cst_7 = arith.constant dense<0.000000e+00> : vector<8xf32>
    %16 = vector.multi_reduction <add>, %15, %cst_7 [1] : vector<8x8xf32> to vector<8xf32>
    %17 = vector.shape_cast %16 : vector<8xf32> to vector<8x1xf32>
    %18 = vector.broadcast %17 : vector<8x1xf32> to vector<8x8xf32>
    %19 = arith.divf %15, %18 : vector<8x8xf32>
    %20 = arith.truncf %19 : vector<8x8xf32> to vector<8x8xbf16>
    %cst_8 = arith.constant dense<0.000000e+00> : vector<8x8xf32>
    %21 = tpu.matmul %20, %6, %cst_8 {dimension_numbers = #tpu.dot_dimension_numbers<[1], [0], [0], [1], [0, 0, 1, 1], [], []>} : vector<8x8xbf16>, vector<8x8xbf16>, vector<8x8xf32> -> vector<8x8xf32>
    %c0_9 = arith.constant 0 : index
    %c8 = arith.constant 8 : index
    %22 = vector.load %arg1[%c0_9, %c8] : memref<8x96xf32, #tpu.memory_space<vmem>>, vector<8x8xf32>
    %23 = arith.truncf %22 : vector<8x8xf32> to vector<8x8xbf16>
    %c0_10 = arith.constant 0 : index
    %c40 = arith.constant 40 : index
    %24 = vector.load %arg1[%c0_10, %c40] : memref<8x96xf32, #tpu.memory_space<vmem>>, vector<8x8xf32>
    %25 = arith.truncf %24 : vector<8x8xf32> to vector<8x8xbf16>
    %c0_11 = arith.constant 0 : index
    %c72 = arith.constant 72 : index
    %26 = vector.load %arg1[%c0_11, %c72] : memref<8x96xf32, #tpu.memory_space<vmem>>, vector<8x8xf32>
    %27 = arith.truncf %26 : vector<8x8xf32> to vector<8x8xbf16>
    %cst_12 = arith.constant dense<0.000000e+00> : vector<8x8xf32>
    %28 = tpu.matmul %23, %25, %cst_12 {dimension_numbers = #tpu.dot_dimension_numbers<[1], [1], [0], [0], [0, 0, 1, 0], [], []>} : vector<8x8xbf16>, vector<8x8xbf16>, vector<8x8xf32> -> vector<8x8xf32>
    %cst_13 = arith.constant 0.353553385 : f32
    %29 = vector.broadcast %cst_13 : f32 to vector<8x8xf32>
    %30 = arith.mulf %28, %29 : vector<8x8xf32>
    %31 = arith.addf %30, %0 : vector<8x8xf32>
    %cst_14 = arith.constant dense<0xFF800000> : vector<8xf32>
    %32 = vector.multi_reduction <maximumf>, %31, %cst_14 [1] : vector<8x8xf32> to vector<8xf32>
    %33 = vector.shape_cast %32 : vector<8xf32> to vector<8x1xf32>
    %34 = vector.broadcast %33 : vector<8x1xf32> to vector<8x8xf32>
    %35 = arith.subf %31, %34 : vector<8x8xf32>
    %36 = math.exp %35 : vector<8x8xf32>
    %cst_15 = arith.constant dense<0.000000e+00> : vector<8xf32>
    %37 = vector.multi_reduction <add>, %36, %cst_15 [1] : vector<8x8xf32> to vector<8xf32>
    %38 = vector.shape_cast %37 : vector<8xf32> to vector<8x1xf32>
    %39 = vector.broadcast %38 : vector<8x1xf32> to vector<8x8xf32>
    %40 = arith.divf %36, %39 : vector<8x8xf32>
    %41 = arith.truncf %40 : vector<8x8xf32> to vector<8x8xbf16>
    %cst_16 = arith.constant dense<0.000000e+00> : vector<8x8xf32>
    %42 = tpu.matmul %41, %27, %cst_16 {dimension_numbers = #tpu.dot_dimension_numbers<[1], [0], [0], [1], [0, 0, 1, 1], [], []>} : vector<8x8xbf16>, vector<8x8xbf16>, vector<8x8xf32> -> vector<8x8xf32>
    %c0_17 = arith.constant 0 : index
    %c16 = arith.constant 16 : index
    %43 = vector.load %arg1[%c0_17, %c16] : memref<8x96xf32, #tpu.memory_space<vmem>>, vector<8x8xf32>
    %44 = arith.truncf %43 : vector<8x8xf32> to vector<8x8xbf16>
    %c0_18 = arith.constant 0 : index
    %c48 = arith.constant 48 : index
    %45 = vector.load %arg1[%c0_18, %c48] : memref<8x96xf32, #tpu.memory_space<vmem>>, vector<8x8xf32>
    %46 = arith.truncf %45 : vector<8x8xf32> to vector<8x8xbf16>
    %c0_19 = arith.constant 0 : index
    %c80 = arith.constant 80 : index
    %47 = vector.load %arg1[%c0_19, %c80] : memref<8x96xf32, #tpu.memory_space<vmem>>, vector<8x8xf32>
    %48 = arith.truncf %47 : vector<8x8xf32> to vector<8x8xbf16>
    %cst_20 = arith.constant dense<0.000000e+00> : vector<8x8xf32>
    %49 = tpu.matmul %44, %46, %cst_20 {dimension_numbers = #tpu.dot_dimension_numbers<[1], [1], [0], [0], [0, 0, 1, 0], [], []>} : vector<8x8xbf16>, vector<8x8xbf16>, vector<8x8xf32> -> vector<8x8xf32>
    %cst_21 = arith.constant 0.353553385 : f32
    %50 = vector.broadcast %cst_21 : f32 to vector<8x8xf32>
    %51 = arith.mulf %49, %50 : vector<8x8xf32>
    %52 = arith.addf %51, %0 : vector<8x8xf32>
    %cst_22 = arith.constant dense<0xFF800000> : vector<8xf32>
    %53 = vector.multi_reduction <maximumf>, %52, %cst_22 [1] : vector<8x8xf32> to vector<8xf32>
    %54 = vector.shape_cast %53 : vector<8xf32> to vector<8x1xf32>
    %55 = vector.broadcast %54 : vector<8x1xf32> to vector<8x8xf32>
    %56 = arith.subf %52, %55 : vector<8x8xf32>
    %57 = math.exp %56 : vector<8x8xf32>
    %cst_23 = arith.constant dense<0.000000e+00> : vector<8xf32>
    %58 = vector.multi_reduction <add>, %57, %cst_23 [1] : vector<8x8xf32> to vector<8xf32>
    %59 = vector.shape_cast %58 : vector<8xf32> to vector<8x1xf32>
    %60 = vector.broadcast %59 : vector<8x1xf32> to vector<8x8xf32>
    %61 = arith.divf %57, %60 : vector<8x8xf32>
    %62 = arith.truncf %61 : vector<8x8xf32> to vector<8x8xbf16>
    %cst_24 = arith.constant dense<0.000000e+00> : vector<8x8xf32>
    %63 = tpu.matmul %62, %48, %cst_24 {dimension_numbers = #tpu.dot_dimension_numbers<[1], [0], [0], [1], [0, 0, 1, 1], [], []>} : vector<8x8xbf16>, vector<8x8xbf16>, vector<8x8xf32> -> vector<8x8xf32>
    %c0_25 = arith.constant 0 : index
    %c24 = arith.constant 24 : index
    %64 = vector.load %arg1[%c0_25, %c24] : memref<8x96xf32, #tpu.memory_space<vmem>>, vector<8x8xf32>
    %65 = arith.truncf %64 : vector<8x8xf32> to vector<8x8xbf16>
    %c0_26 = arith.constant 0 : index
    %c56 = arith.constant 56 : index
    %66 = vector.load %arg1[%c0_26, %c56] : memref<8x96xf32, #tpu.memory_space<vmem>>, vector<8x8xf32>
    %67 = arith.truncf %66 : vector<8x8xf32> to vector<8x8xbf16>
    %c0_27 = arith.constant 0 : index
    %c88 = arith.constant 88 : index
    %68 = vector.load %arg1[%c0_27, %c88] : memref<8x96xf32, #tpu.memory_space<vmem>>, vector<8x8xf32>
    %69 = arith.truncf %68 : vector<8x8xf32> to vector<8x8xbf16>
    %cst_28 = arith.constant dense<0.000000e+00> : vector<8x8xf32>
    %70 = tpu.matmul %65, %67, %cst_28 {dimension_numbers = #tpu.dot_dimension_numbers<[1], [1], [0], [0], [0, 0, 1, 0], [], []>} : vector<8x8xbf16>, vector<8x8xbf16>, vector<8x8xf32> -> vector<8x8xf32>
    %cst_29 = arith.constant 0.353553385 : f32
    %71 = vector.broadcast %cst_29 : f32 to vector<8x8xf32>
    %72 = arith.mulf %70, %71 : vector<8x8xf32>
    %73 = arith.addf %72, %0 : vector<8x8xf32>
    %cst_30 = arith.constant dense<0xFF800000> : vector<8xf32>
    %74 = vector.multi_reduction <maximumf>, %73, %cst_30 [1] : vector<8x8xf32> to vector<8xf32>
    %75 = vector.shape_cast %74 : vector<8xf32> to vector<8x1xf32>
    %76 = vector.broadcast %75 : vector<8x1xf32> to vector<8x8xf32>
    %77 = arith.subf %73, %76 : vector<8x8xf32>
    %78 = math.exp %77 : vector<8x8xf32>
    %cst_31 = arith.constant dense<0.000000e+00> : vector<8xf32>
    %79 = vector.multi_reduction <add>, %78, %cst_31 [1] : vector<8x8xf32> to vector<8xf32>
    %80 = vector.shape_cast %79 : vector<8xf32> to vector<8x1xf32>
    %81 = vector.broadcast %80 : vector<8x1xf32> to vector<8x8xf32>
    %82 = arith.divf %78, %81 : vector<8x8xf32>
    %83 = arith.truncf %82 : vector<8x8xf32> to vector<8x8xbf16>
    %cst_32 = arith.constant dense<0.000000e+00> : vector<8x8xf32>
    %84 = tpu.matmul %83, %69, %cst_32 {dimension_numbers = #tpu.dot_dimension_numbers<[1], [0], [0], [1], [0, 0, 1, 1], [], []>} : vector<8x8xbf16>, vector<8x8xbf16>, vector<8x8xf32> -> vector<8x8xf32>
    %85 = tpu.concatenate %21, %42, %63, %84 in 1 : vector<8x8xf32>, vector<8x8xf32>, vector<8x8xf32>, vector<8x8xf32> -> vector<8x32xf32>
    %86 = arith.truncf %85 : vector<8x32xf32> to vector<8x32xbf16>
    %c0_33 = arith.constant 0 : index
    %c0_34 = arith.constant 0 : index
    %87 = vector.load %arg3[%c0_33, %c0_34] : memref<32x32xbf16, #tpu.memory_space<vmem>>, vector<32x32xbf16>
    %cst_35 = arith.constant dense<0.000000e+00> : vector<8x32xf32>
    %88 = tpu.matmul %86, %87, %cst_35 {dimension_numbers = #tpu.dot_dimension_numbers<[1], [0], [0], [1], [0, 0, 1, 1], [], []>} : vector<8x32xbf16>, vector<32x32xbf16>, vector<8x32xf32> -> vector<8x32xf32>
    %c0_36 = arith.constant 0 : index
    %c0_37 = arith.constant 0 : index
    %89 = vector.load %arg4[%c0_36, %c0_37] : memref<1x32xf32, #tpu.memory_space<vmem>>, vector<1x32xf32>
    %90 = vector.broadcast %89 : vector<1x32xf32> to vector<8x32xf32>
    %91 = arith.addf %88, %90 : vector<8x32xf32>
    %c0_38 = arith.constant 0 : index
    %c0_39 = arith.constant 0 : index
    %92 = vector.load %arg5[%c0_38, %c0_39] : memref<8x32xf32, #tpu.memory_space<vmem>>, vector<8x32xf32>
    %93 = arith.addf %92, %91 : vector<8x32xf32>
    %c0_40 = arith.constant 0 : index
    %c0_41 = arith.constant 0 : index
    %94 = vector.load %arg6[%c0_40, %c0_41] : memref<8x32xf32, #tpu.memory_space<vmem>>, vector<8x32xf32>
    tpu.vector_store %arg6[%c0_40, %c0_41], %93 {strides = array<i32>} : memref<8x32xf32, #tpu.memory_space<vmem>>, vector<8x32xf32>,
    return
  }
  func.func @transform_0(%arg0: i32) -> (i32, i32) {
    %c0_i32 = arith.constant 0 : i32
    %c0_i32_0 = arith.constant 0 : i32
    return %arg0, %c0_i32 : i32, i32
  }
  func.func @transform_1(%arg0: i32) -> (i32, i32) {
    %c0_i32 = arith.constant 0 : i32
    %c0_i32_0 = arith.constant 0 : i32
    %c0_i32_1 = arith.constant 0 : i32
    return %c0_i32, %c0_i32_0 : i32, i32
  }
  func.func @transform_2(%arg0: i32) -> (i32, i32) {
    %c0_i32 = arith.constant 0 : i32
    %c0_i32_0 = arith.constant 0 : i32
    %c0_i32_1 = arith.constant 0 : i32
    return %c0_i32, %c0_i32_0 : i32, i32
  }
  func.func @transform_3(%arg0: i32) -> (i32, i32) {
    %c0_i32 = arith.constant 0 : i32
    %c0_i32_0 = arith.constant 0 : i32
    %c0_i32_1 = arith.constant 0 : i32
    return %c0_i32, %c0_i32_0 : i32, i32
  }
  func.func @transform_4(%arg0: i32) -> (i32, i32) {
    %c0_i32 = arith.constant 0 : i32
    %c0_i32_0 = arith.constant 0 : i32
    return %arg0, %c0_i32 : i32, i32
  }
  func.func @transform_5(%arg0: i32) -> (i32, i32) {
    %c0_i32 = arith.constant 0 : i32
    %c0_i32_0 = arith.constant 0 : i32
    return %arg0, %c0_i32 : i32, i32
  }
}

module attributes {stable_mosaic.version = 11 : i64} {
  func.func @_ln_matmul_kernel(%arg0: i32, %arg1: i32, %arg2: memref<16x32xf32, #tpu.memory_space<vmem>>, %arg3: memref<1x32xf32, #tpu.memory_space<vmem>>, %arg4: memref<1x32xf32, #tpu.memory_space<vmem>>, %arg5: memref<32x96xbf16, #tpu.memory_space<vmem>>, %arg6: memref<1x96xf32, #tpu.memory_space<vmem>>, %arg7: memref<16x96xf32, #tpu.memory_space<vmem>>) attributes {dimension_semantics = [#tpu.dimension_semantics<parallel>, #tpu.dimension_semantics<parallel>], iteration_bounds = array<i64: 1, 1>, scalar_prefetch = 0 : i64, scratch_operands = 0 : i64, tpu.core_type = #tpu.core_type<tc>, window_params = [{transform_indices = @transform_0, window_bounds = array<i64: 16, 32>}, {pipeline_mode = #tpu.pipeline_mode<synchronous>, transform_indices = @transform_1, window_bounds = array<i64: 1, 32>}, {pipeline_mode = #tpu.pipeline_mode<synchronous>, transform_indices = @transform_2, window_bounds = array<i64: 1, 32>}, {transform_indices = @transform_3, window_bounds = array<i64: 32, 96>}, {transform_indices = @transform_4, window_bounds = array<i64: 1, 96>}, {transform_indices = @transform_5, window_bounds = array<i64: 16, 96>}]} {
    %c0 = arith.constant 0 : index
    %c0_0 = arith.constant 0 : index
    %0 = vector.load %arg2[%c0, %c0_0] : memref<16x32xf32, #tpu.memory_space<vmem>>, vector<16x32xf32>
    %cst = arith.constant dense<0.000000e+00> : vector<16xf32>
    %1 = vector.multi_reduction <add>, %0, %cst [1] : vector<16x32xf32> to vector<16xf32>
    %2 = vector.shape_cast %1 : vector<16xf32> to vector<16x1xf32>
    %cst_1 = arith.constant 3.200000e+01 : f32
    %3 = vector.broadcast %cst_1 : f32 to vector<16x1xf32>
    %4 = arith.divf %2, %3 : vector<16x1xf32>
    %5 = vector.broadcast %4 : vector<16x1xf32> to vector<16x32xf32>
    %6 = arith.subf %0, %5 : vector<16x32xf32>
    %7 = arith.mulf %6, %6 : vector<16x32xf32>
    %cst_2 = arith.constant dense<0.000000e+00> : vector<16xf32>
    %8 = vector.multi_reduction <add>, %7, %cst_2 [1] : vector<16x32xf32> to vector<16xf32>
    %9 = vector.shape_cast %8 : vector<16xf32> to vector<16x1xf32>
    %cst_3 = arith.constant 3.200000e+01 : f32
    %10 = vector.broadcast %cst_3 : f32 to vector<16x1xf32>
    %11 = arith.divf %9, %10 : vector<16x1xf32>
    %12 = vector.broadcast %4 : vector<16x1xf32> to vector<16x32xf32>
    %13 = arith.subf %0, %12 : vector<16x32xf32>
    %cst_4 = arith.constant 9.99999974E-6 : f32
    %14 = vector.broadcast %cst_4 : f32 to vector<16x1xf32>
    %15 = arith.addf %11, %14 : vector<16x1xf32>
    %16 = math.rsqrt %15 : vector<16x1xf32>
    %17 = vector.broadcast %16 : vector<16x1xf32> to vector<16x32xf32>
    %18 = arith.mulf %13, %17 : vector<16x32xf32>
    %c0_5 = arith.constant 0 : index
    %c0_6 = arith.constant 0 : index
    %19 = vector.load %arg3[%c0_5, %c0_6] : memref<1x32xf32, #tpu.memory_space<vmem>>, vector<1x32xf32>
    %20 = vector.broadcast %19 : vector<1x32xf32> to vector<16x32xf32>
    %21 = arith.mulf %18, %20 : vector<16x32xf32>
    %c0_7 = arith.constant 0 : index
    %c0_8 = arith.constant 0 : index
    %22 = vector.load %arg4[%c0_7, %c0_8] : memref<1x32xf32, #tpu.memory_space<vmem>>, vector<1x32xf32>
    %23 = vector.broadcast %22 : vector<1x32xf32> to vector<16x32xf32>
    %24 = arith.addf %21, %23 : vector<16x32xf32>
    %25 = arith.truncf %24 : vector<16x32xf32> to vector<16x32xbf16>
    %c0_9 = arith.constant 0 : index
    %c0_10 = arith.constant 0 : index
    %26 = vector.load %arg5[%c0_9, %c0_10] : memref<32x96xbf16, #tpu.memory_space<vmem>>, vector<32x96xbf16>
    %cst_11 = arith.constant dense<0.000000e+00> : vector<16x96xf32>
    %27 = tpu.matmul %25, %26, %cst_11 {dimension_numbers = #tpu.dot_dimension_numbers<[1], [0], [0], [1], [0, 0, 1, 1], [], []>} : vector<16x32xbf16>, vector<32x96xbf16>, vector<16x96xf32> -> vector<16x96xf32>
    %c0_12 = arith.constant 0 : index
    %c0_13 = arith.constant 0 : index
    %28 = vector.load %arg6[%c0_12, %c0_13] : memref<1x96xf32, #tpu.memory_space<vmem>>, vector<1x96xf32>
    %29 = vector.broadcast %28 : vector<1x96xf32> to vector<16x96xf32>
    %30 = arith.addf %27, %29 : vector<16x96xf32>
    %c0_14 = arith.constant 0 : index
    %c0_15 = arith.constant 0 : index
    %31 = vector.load %arg7[%c0_14, %c0_15] : memref<16x96xf32, #tpu.memory_space<vmem>>, vector<16x96xf32>
    tpu.vector_store %arg7[%c0_14, %c0_15], %30 {strides = array<i32>} : memref<16x96xf32, #tpu.memory_space<vmem>>, vector<16x96xf32>,
    return
  }
  func.func @transform_0(%arg0: i32, %arg1: i32) -> (i32, i32) {
    %c0_i32 = arith.constant 0 : i32
    %c0_i32_0 = arith.constant 0 : i32
    return %arg0, %c0_i32 : i32, i32
  }
  func.func @transform_1(%arg0: i32, %arg1: i32) -> (i32, i32) {
    %c0_i32 = arith.constant 0 : i32
    %c0_i32_0 = arith.constant 0 : i32
    %c0_i32_1 = arith.constant 0 : i32
    return %c0_i32, %c0_i32_0 : i32, i32
  }
  func.func @transform_2(%arg0: i32, %arg1: i32) -> (i32, i32) {
    %c0_i32 = arith.constant 0 : i32
    %c0_i32_0 = arith.constant 0 : i32
    %c0_i32_1 = arith.constant 0 : i32
    return %c0_i32, %c0_i32_0 : i32, i32
  }
  func.func @transform_3(%arg0: i32, %arg1: i32) -> (i32, i32) {
    %c0_i32 = arith.constant 0 : i32
    %c0_i32_0 = arith.constant 0 : i32
    return %c0_i32, %arg1 : i32, i32
  }
  func.func @transform_4(%arg0: i32, %arg1: i32) -> (i32, i32) {
    %c0_i32 = arith.constant 0 : i32
    %c0_i32_0 = arith.constant 0 : i32
    return %c0_i32, %arg1 : i32, i32
  }
  func.func @transform_5(%arg0: i32, %arg1: i32) -> (i32, i32) {
    %c0_i32 = arith.constant 0 : i32
    return %arg0, %arg1 : i32, i32
  }
}

module attributes {stable_mosaic.version = 11 : i64} {
  func.func @_moe_kernel(%arg0: i32, %arg1: i32, %arg2: memref<16x32xf32, #tpu.memory_space<vmem>>, %arg3: memref<1x32xf32, #tpu.memory_space<vmem>>, %arg4: memref<1x32xf32, #tpu.memory_space<vmem>>, %arg5: memref<32x128xbf16, #tpu.memory_space<vmem>>, %arg6: memref<1x128xf32, #tpu.memory_space<vmem>>, %arg7: memref<32x256xbf16, #tpu.memory_space<vmem>>, %arg8: memref<1x256xf32, #tpu.memory_space<vmem>>, %arg9: memref<256x32xbf16, #tpu.memory_space<vmem>>, %arg10: memref<1x32xf32, #tpu.memory_space<vmem>>, %arg11: memref<16x32xf32, #tpu.memory_space<vmem>>, %arg12: memref<1x1x128xf32, #tpu.memory_space<vmem>>, %arg13: memref<1x1x128xf32, #tpu.memory_space<vmem>>, %arg14: memref<16x1xf32, #tpu.memory_space<vmem>>, %arg15: memref<16x32xbf16, #tpu.memory_space<vmem>>, %arg16: memref<16x1xf32, #tpu.memory_space<vmem>>, %arg17: memref<16x32xf32, #tpu.memory_space<vmem>>) attributes {dimension_semantics = [#tpu.dimension_semantics<parallel>, #tpu.dimension_semantics<arbitrary>], iteration_bounds = array<i64: 1, 1>, scalar_prefetch = 0 : i64, scratch_operands = 3 : i64, tpu.core_type = #tpu.core_type<tc>, window_params = [{transform_indices = @transform_0, window_bounds = array<i64: 16, 32>}, {pipeline_mode = #tpu.pipeline_mode<synchronous>, transform_indices = @transform_1, window_bounds = array<i64: 1, 32>}, {pipeline_mode = #tpu.pipeline_mode<synchronous>, transform_indices = @transform_2, window_bounds = array<i64: 1, 32>}, {pipeline_mode = #tpu.pipeline_mode<synchronous>, transform_indices = @transform_3, window_bounds = array<i64: 32, 128>}, {pipeline_mode = #tpu.pipeline_mode<synchronous>, transform_indices = @transform_4, window_bounds = array<i64: 1, 128>}, {transform_indices = @transform_5, window_bounds = array<i64: 32, 256>}, {transform_indices = @transform_6, window_bounds = array<i64: 1, 256>}, {transform_indices = @transform_7, window_bounds = array<i64: 256, 32>}, {pipeline_mode = #tpu.pipeline_mode<synchronous>, transform_indices = @transform_8, window_bounds = array<i64: 1, 32>}, {transform_indices = @transform_9, window_bounds = array<i64: 16, 32>}, {transform_indices = @transform_10, window_bounds = array<i64: 1, 1, 128>}, {transform_indices = @transform_11, window_bounds = array<i64: 1, 1, 128>}, {transform_indices = @transform_12, window_bounds = array<i64: 16, 1>}]} {
    %c0_i32 = arith.constant 0 : i32
    %0 = arith.cmpi eq, %arg1, %c0_i32 : i32
    %1 = arith.extui %0 : i1 to i32
    %c0_i32_0 = arith.constant 0 : i32
    %2 = arith.cmpi ne, %1, %c0_i32_0 : i32
    scf.if %2 {
      %c0_16 = arith.constant 0 : index
      %c0_17 = arith.constant 0 : index
      %20 = vector.load %arg2[%c0_16, %c0_17] : memref<16x32xf32, #tpu.memory_space<vmem>>, vector<16x32xf32>
      %cst_18 = arith.constant dense<0.000000e+00> : vector<16xf32>
      %21 = vector.multi_reduction <add>, %20, %cst_18 [1] : vector<16x32xf32> to vector<16xf32>
      %22 = vector.shape_cast %21 : vector<16xf32> to vector<16x1xf32>
      %cst_19 = arith.constant 3.200000e+01 : f32
      %23 = vector.broadcast %cst_19 : f32 to vector<16x1xf32>
      %24 = arith.divf %22, %23 : vector<16x1xf32>
      %25 = vector.broadcast %24 : vector<16x1xf32> to vector<16x32xf32>
      %26 = arith.subf %20, %25 : vector<16x32xf32>
      %27 = arith.mulf %26, %26 : vector<16x32xf32>
      %cst_20 = arith.constant dense<0.000000e+00> : vector<16xf32>
      %28 = vector.multi_reduction <add>, %27, %cst_20 [1] : vector<16x32xf32> to vector<16xf32>
      %29 = vector.shape_cast %28 : vector<16xf32> to vector<16x1xf32>
      %cst_21 = arith.constant 3.200000e+01 : f32
      %30 = vector.broadcast %cst_21 : f32 to vector<16x1xf32>
      %31 = arith.divf %29, %30 : vector<16x1xf32>
      %32 = vector.broadcast %24 : vector<16x1xf32> to vector<16x32xf32>
      %33 = arith.subf %20, %32 : vector<16x32xf32>
      %cst_22 = arith.constant 9.99999974E-6 : f32
      %34 = vector.broadcast %cst_22 : f32 to vector<16x1xf32>
      %35 = arith.addf %31, %34 : vector<16x1xf32>
      %36 = math.rsqrt %35 : vector<16x1xf32>
      %37 = vector.broadcast %36 : vector<16x1xf32> to vector<16x32xf32>
      %38 = arith.mulf %33, %37 : vector<16x32xf32>
      %c0_23 = arith.constant 0 : index
      %c0_24 = arith.constant 0 : index
      %39 = vector.load %arg3[%c0_23, %c0_24] : memref<1x32xf32, #tpu.memory_space<vmem>>, vector<1x32xf32>
      %40 = vector.broadcast %39 : vector<1x32xf32> to vector<16x32xf32>
      %41 = arith.mulf %38, %40 : vector<16x32xf32>
      %c0_25 = arith.constant 0 : index
      %c0_26 = arith.constant 0 : index
      %42 = vector.load %arg4[%c0_25, %c0_26] : memref<1x32xf32, #tpu.memory_space<vmem>>, vector<1x32xf32>
      %43 = vector.broadcast %42 : vector<1x32xf32> to vector<16x32xf32>
      %44 = arith.addf %41, %43 : vector<16x32xf32>
      %45 = arith.truncf %44 : vector<16x32xf32> to vector<16x32xbf16>
      %c0_27 = arith.constant 0 : index
      %c0_28 = arith.constant 0 : index
      %46 = vector.load %arg15[%c0_27, %c0_28] : memref<16x32xbf16, #tpu.memory_space<vmem>>, vector<16x32xbf16>
      tpu.vector_store %arg15[%c0_27, %c0_28], %45 {strides = array<i32>} : memref<16x32xbf16, #tpu.memory_space<vmem>>, vector<16x32xbf16>,
      %c0_29 = arith.constant 0 : index
      %c0_30 = arith.constant 0 : index
      %47 = vector.load %arg5[%c0_29, %c0_30] : memref<32x128xbf16, #tpu.memory_space<vmem>>, vector<32x128xbf16>
      %cst_31 = arith.constant dense<0.000000e+00> : vector<16x128xf32>
      %48 = tpu.matmul %45, %47, %cst_31 {dimension_numbers = #tpu.dot_dimension_numbers<[1], [0], [0], [1], [0, 0, 1, 1], [], []>} : vector<16x32xbf16>, vector<32x128xbf16>, vector<16x128xf32> -> vector<16x128xf32>
      %c0_32 = arith.constant 0 : index
      %c0_33 = arith.constant 0 : index
      %49 = vector.load %arg6[%c0_32, %c0_33] : memref<1x128xf32, #tpu.memory_space<vmem>>, vector<1x128xf32>
      %50 = vector.broadcast %49 : vector<1x128xf32> to vector<16x128xf32>
      %51 = arith.addf %48, %50 : vector<16x128xf32>
      %cst_34 = arith.constant dense<0xFF800000> : vector<16xf32>
      %52 = vector.multi_reduction <maximumf>, %51, %cst_34 [1] : vector<16x128xf32> to vector<16xf32>
      %53 = vector.shape_cast %52 : vector<16xf32> to vector<16x1xf32>
      %54 = vector.broadcast %53 : vector<16x1xf32> to vector<16x128xf32>
      %55 = arith.subf %51, %54 : vector<16x128xf32>
      %56 = math.exp %55 : vector<16x128xf32>
      %cst_35 = arith.constant dense<0.000000e+00> : vector<16xf32>
      %57 = vector.multi_reduction <add>, %56, %cst_35 [1] : vector<16x128xf32> to vector<16xf32>
      %58 = vector.shape_cast %57 : vector<16xf32> to vector<16x1xf32>
      %59 = vector.broadcast %58 : vector<16x1xf32> to vector<16x128xf32>
      %60 = arith.divf %56, %59 : vector<16x128xf32>
      %cst_36 = arith.constant dense<0xFF800000> : vector<16xf32>
      %61 = vector.multi_reduction <maximumf>, %60, %cst_36 [1] : vector<16x128xf32> to vector<16xf32>
      %62 = vector.shape_cast %61 : vector<16xf32> to vector<16x1xf32>
      %63 = tpu.iota {dimensions = array<i32: 1>} : vector<16x128xi32>
      %64 = vector.broadcast %62 : vector<16x1xf32> to vector<16x128xf32>
      %65 = arith.cmpf oge, %60, %64 : vector<16x128xf32>
      %c128_i32 = arith.constant 128 : i32
      %66 = vector.broadcast %c128_i32 : i32 to vector<16x128xi32>
      %67 = arith.select %65, %63, %66 : vector<16x128xi1>, vector<16x128xi32>
      %cst_37 = arith.constant dense<2147483647> : vector<16xi32>
      %68 = vector.multi_reduction <minsi>, %67, %cst_37 [1] : vector<16x128xi32> to vector<16xi32>
      %69 = vector.shape_cast %68 : vector<16xi32> to vector<16x1xi32>
      %70 = vector.broadcast %69 : vector<16x1xi32> to vector<16x128xi32>
      %71 = arith.cmpi eq, %63, %70 : vector<16x128xi32>
      %72 = arith.extui %71 : vector<16x128xi1> to vector<16x128xi32>
      %73 = arith.sitofp %72 : vector<16x128xi32> to vector<16x128xf32>
      %cst_38 = arith.constant dense<0.000000e+00> : vector<128xf32>
      %74 = vector.multi_reduction <add>, %73, %cst_38 [0] : vector<16x128xf32> to vector<128xf32>
      %75 = vector.shape_cast %74 : vector<128xf32> to vector<1x128xf32>
      %76 = vector.shape_cast %75 : vector<1x128xf32> to vector<1x1x128xf32>
      %c0_39 = arith.constant 0 : index
      %c0_40 = arith.constant 0 : index
      %c0_41 = arith.constant 0 : index
      %77 = vector.load %arg12[%c0_39, %c0_40, %c0_41] : memref<1x1x128xf32, #tpu.memory_space<vmem>>, vector<1x1x128xf32>
      tpu.vector_store %arg12[%c0_39, %c0_40, %c0_41], %76 {strides = array<i32>} : memref<1x1x128xf32, #tpu.memory_space<vmem>>, vector<1x1x128xf32>,
      %cst_42 = arith.constant dense<0.000000e+00> : vector<128xf32>
      %78 = vector.multi_reduction <add>, %60, %cst_42 [0] : vector<16x128xf32> to vector<128xf32>
      %79 = vector.shape_cast %78 : vector<128xf32> to vector<1x128xf32>
      %80 = vector.shape_cast %79 : vector<1x128xf32> to vector<1x1x128xf32>
      %c0_43 = arith.constant 0 : index
      %c0_44 = arith.constant 0 : index
      %c0_45 = arith.constant 0 : index
      %81 = vector.load %arg13[%c0_43, %c0_44, %c0_45] : memref<1x1x128xf32, #tpu.memory_space<vmem>>, vector<1x1x128xf32>
      tpu.vector_store %arg13[%c0_43, %c0_44, %c0_45], %80 {strides = array<i32>} : memref<1x1x128xf32, #tpu.memory_space<vmem>>, vector<1x1x128xf32>,
      %c0_46 = arith.constant 0 : index
      %c0_47 = arith.constant 0 : index
      %82 = vector.load %arg14[%c0_46, %c0_47] : memref<16x1xf32, #tpu.memory_space<vmem>>, vector<16x1xf32>
      tpu.vector_store %arg14[%c0_46, %c0_47], %62 {strides = array<i32>} : memref<16x1xf32, #tpu.memory_space<vmem>>, vector<16x1xf32>,
      %c0_48 = arith.constant 0 : index
      %c0_49 = arith.constant 0 : index
      %83 = vector.load %arg16[%c0_48, %c0_49] : memref<16x1xf32, #tpu.memory_space<vmem>>, vector<16x1xf32>
      tpu.vector_store %arg16[%c0_48, %c0_49], %62 {strides = array<i32>} : memref<16x1xf32, #tpu.memory_space<vmem>>, vector<16x1xf32>,
      %cst_50 = arith.constant 0.000000e+00 : f32
      %84 = vector.broadcast %cst_50 : f32 to vector<16x32xf32>
      %c0_51 = arith.constant 0 : index
      %c0_52 = arith.constant 0 : index
      %85 = vector.load %arg17[%c0_51, %c0_52] : memref<16x32xf32, #tpu.memory_space<vmem>>, vector<16x32xf32>
      tpu.vector_store %arg17[%c0_51, %c0_52], %84 {strides = array<i32>} : memref<16x32xf32, #tpu.memory_space<vmem>>, vector<16x32xf32>,
    } else {
    }
    %c0 = arith.constant 0 : index
    %c0_1 = arith.constant 0 : index
    %3 = vector.load %arg15[%c0, %c0_1] : memref<16x32xbf16, #tpu.memory_space<vmem>>, vector<16x32xbf16>
    %c0_2 = arith.constant 0 : index
    %c0_3 = arith.constant 0 : index
    %4 = vector.load %arg7[%c0_2, %c0_3] : memref<32x256xbf16, #tpu.memory_space<vmem>>, vector<32x256xbf16>
    %cst = arith.constant dense<0.000000e+00> : vector<16x256xf32>
    %5 = tpu.matmul %3, %4, %cst {dimension_numbers = #tpu.dot_dimension_numbers<[1], [0], [0], [1], [0, 0, 1, 1], [], []>} : vector<16x32xbf16>, vector<32x256xbf16>, vector<16x256xf32> -> vector<16x256xf32>
    %c0_4 = arith.constant 0 : index
    %c0_5 = arith.constant 0 : index
    %6 = vector.load %arg8[%c0_4, %c0_5] : memref<1x256xf32, #tpu.memory_space<vmem>>, vector<1x256xf32>
    %7 = vector.broadcast %6 : vector<1x256xf32> to vector<16x256xf32>
    %8 = arith.addf %5, %7 : vector<16x256xf32>
    %cst_6 = arith.constant 0.000000e+00 : f32
    %9 = vector.broadcast %cst_6 : f32 to vector<16x256xf32>
    %10 = arith.maximumf %8, %9 : vector<16x256xf32>
    %c0_7 = arith.constant 0 : index
    %c0_8 = arith.constant 0 : index
    %11 = vector.load %arg17[%c0_7, %c0_8] : memref<16x32xf32, #tpu.memory_space<vmem>>, vector<16x32xf32>
    %12 = arith.truncf %10 : vector<16x256xf32> to vector<16x256xbf16>
    %c0_9 = arith.constant 0 : index
    %c0_10 = arith.constant 0 : index
    %13 = vector.load %arg9[%c0_9, %c0_10] : memref<256x32xbf16, #tpu.memory_space<vmem>>, vector<256x32xbf16>
    %cst_11 = arith.constant dense<0.000000e+00> : vector<16x32xf32>
    %14 = tpu.matmul %12, %13, %cst_11 {dimension_numbers = #tpu.dot_dimension_numbers<[1], [0], [0], [1], [0, 0, 1, 1], [], []>} : vector<16x256xbf16>, vector<256x32xbf16>, vector<16x32xf32> -> vector<16x32xf32>
    %15 = arith.addf %11, %14 : vector<16x32xf32>
    %c0_12 = arith.constant 0 : index
    %c0_13 = arith.constant 0 : index
    %16 = vector.load %arg17[%c0_12, %c0_13] : memref<16x32xf32, #tpu.memory_space<vmem>>, vector<16x32xf32>
    tpu.vector_store %arg17[%c0_12, %c0_13], %15 {strides = array<i32>} : memref<16x32xf32, #tpu.memory_space<vmem>>, vector<16x32xf32>,
    %c0_i32_14 = arith.constant 0 : i32
    %17 = arith.cmpi eq, %arg1, %c0_i32_14 : i32
    %18 = arith.extui %17 : i1 to i32
    %c0_i32_15 = arith.constant 0 : i32
    %19 = arith.cmpi ne, %18, %c0_i32_15 : i32
    scf.if %19 {
      %c0_16 = arith.constant 0 : index
      %c0_17 = arith.constant 0 : index
      %20 = vector.load %arg17[%c0_16, %c0_17] : memref<16x32xf32, #tpu.memory_space<vmem>>, vector<16x32xf32>
      %c0_18 = arith.constant 0 : index
      %c0_19 = arith.constant 0 : index
      %21 = vector.load %arg10[%c0_18, %c0_19] : memref<1x32xf32, #tpu.memory_space<vmem>>, vector<1x32xf32>
      %22 = vector.broadcast %21 : vector<1x32xf32> to vector<16x32xf32>
      %23 = arith.addf %20, %22 : vector<16x32xf32>
      %c0_20 = arith.constant 0 : index
      %c0_21 = arith.constant 0 : index
      %24 = vector.load %arg2[%c0_20, %c0_21] : memref<16x32xf32, #tpu.memory_space<vmem>>, vector<16x32xf32>
      %c0_22 = arith.constant 0 : index
      %c0_23 = arith.constant 0 : index
      %25 = vector.load %arg16[%c0_22, %c0_23] : memref<16x1xf32, #tpu.memory_space<vmem>>, vector<16x1xf32>
      %26 = vector.broadcast %25 : vector<16x1xf32> to vector<16x32xf32>
      %27 = arith.mulf %23, %26 : vector<16x32xf32>
      %28 = arith.addf %24, %27 : vector<16x32xf32>
      %c0_24 = arith.constant 0 : index
      %c0_25 = arith.constant 0 : index
      %29 = vector.load %arg11[%c0_24, %c0_25] : memref<16x32xf32, #tpu.memory_space<vmem>>, vector<16x32xf32>
      tpu.vector_store %arg11[%c0_24, %c0_25], %28 {strides = array<i32>} : memref<16x32xf32, #tpu.memory_space<vmem>>, vector<16x32xf32>,
    } else {
    }
    return
  }
  func.func @transform_0(%arg0: i32, %arg1: i32) -> (i32, i32) {
    %c0_i32 = arith.constant 0 : i32
    %c0_i32_0 = arith.constant 0 : i32
    return %arg0, %c0_i32 : i32, i32
  }
  func.func @transform_1(%arg0: i32, %arg1: i32) -> (i32, i32) {
    %c0_i32 = arith.constant 0 : i32
    %c0_i32_0 = arith.constant 0 : i32
    %c0_i32_1 = arith.constant 0 : i32
    return %c0_i32, %c0_i32_0 : i32, i32
  }
  func.func @transform_2(%arg0: i32, %arg1: i32) -> (i32, i32) {
    %c0_i32 = arith.constant 0 : i32
    %c0_i32_0 = arith.constant 0 : i32
    %c0_i32_1 = arith.constant 0 : i32
    return %c0_i32, %c0_i32_0 : i32, i32
  }
  func.func @transform_3(%arg0: i32, %arg1: i32) -> (i32, i32) {
    %c0_i32 = arith.constant 0 : i32
    %c0_i32_0 = arith.constant 0 : i32
    %c0_i32_1 = arith.constant 0 : i32
    return %c0_i32, %c0_i32_0 : i32, i32
  }
  func.func @transform_4(%arg0: i32, %arg1: i32) -> (i32, i32) {
    %c0_i32 = arith.constant 0 : i32
    %c0_i32_0 = arith.constant 0 : i32
    %c0_i32_1 = arith.constant 0 : i32
    return %c0_i32, %c0_i32_0 : i32, i32
  }
  func.func @transform_5(%arg0: i32, %arg1: i32) -> (i32, i32) {
    %c0_i32 = arith.constant 0 : i32
    %c0_i32_0 = arith.constant 0 : i32
    return %c0_i32, %arg1 : i32, i32
  }
  func.func @transform_6(%arg0: i32, %arg1: i32) -> (i32, i32) {
    %c0_i32 = arith.constant 0 : i32
    %c0_i32_0 = arith.constant 0 : i32
    return %c0_i32, %arg1 : i32, i32
  }
  func.func @transform_7(%arg0: i32, %arg1: i32) -> (i32, i32) {
    %c0_i32 = arith.constant 0 : i32
    %c0_i32_0 = arith.constant 0 : i32
    return %arg1, %c0_i32 : i32, i32
  }
  func.func @transform_8(%arg0: i32, %arg1: i32) -> (i32, i32) {
    %c0_i32 = arith.constant 0 : i32
    %c0_i32_0 = arith.constant 0 : i32
    %c0_i32_1 = arith.constant 0 : i32
    return %c0_i32, %c0_i32_0 : i32, i32
  }
  func.func @transform_9(%arg0: i32, %arg1: i32) -> (i32, i32) {
    %c0_i32 = arith.constant 0 : i32
    %c0_i32_0 = arith.constant 0 : i32
    return %arg0, %c0_i32 : i32, i32
  }
  func.func @transform_10(%arg0: i32, %arg1: i32) -> (i32, i32, i32) {
    %c0_i32 = arith.constant 0 : i32
    %c0_i32_0 = arith.constant 0 : i32
    %c0_i32_1 = arith.constant 0 : i32
    return %arg0, %c0_i32, %c0_i32_0 : i32, i32, i32
  }
  func.func @transform_11(%arg0: i32, %arg1: i32) -> (i32, i32, i32) {
    %c0_i32 = arith.constant 0 : i32
    %c0_i32_0 = arith.constant 0 : i32
    %c0_i32_1 = arith.constant 0 : i32
    return %arg0, %c0_i32, %c0_i32_0 : i32, i32, i32
  }
  func.func @transform_12(%arg0: i32, %arg1: i32) -> (i32, i32) {
    %c0_i32 = arith.constant 0 : i32
    %c0_i32_0 = arith.constant 0 : i32
    return %arg0, %c0_i32 : i32, i32
  }
}

module attributes {stable_mosaic.version = 11 : i64} {
  func.func @_layernorm_kernel(%arg0: i32, %arg1: memref<16x32xf32, #tpu.memory_space<vmem>>, %arg2: memref<1x32xf32, #tpu.memory_space<vmem>>, %arg3: memref<1x32xf32, #tpu.memory_space<vmem>>, %arg4: memref<16x32xf32, #tpu.memory_space<vmem>>) attributes {dimension_semantics = [#tpu.dimension_semantics<parallel>], iteration_bounds = array<i64: 1>, scalar_prefetch = 0 : i64, scratch_operands = 0 : i64, tpu.core_type = #tpu.core_type<tc>, window_params = [{transform_indices = @transform_0, window_bounds = array<i64: 16, 32>}, {pipeline_mode = #tpu.pipeline_mode<synchronous>, transform_indices = @transform_1, window_bounds = array<i64: 1, 32>}, {pipeline_mode = #tpu.pipeline_mode<synchronous>, transform_indices = @transform_2, window_bounds = array<i64: 1, 32>}, {transform_indices = @transform_3, window_bounds = array<i64: 16, 32>}]} {
    %c0 = arith.constant 0 : index
    %c0_0 = arith.constant 0 : index
    %0 = vector.load %arg1[%c0, %c0_0] : memref<16x32xf32, #tpu.memory_space<vmem>>, vector<16x32xf32>
    %cst = arith.constant dense<0.000000e+00> : vector<16xf32>
    %1 = vector.multi_reduction <add>, %0, %cst [1] : vector<16x32xf32> to vector<16xf32>
    %2 = vector.shape_cast %1 : vector<16xf32> to vector<16x1xf32>
    %cst_1 = arith.constant 3.200000e+01 : f32
    %3 = vector.broadcast %cst_1 : f32 to vector<16x1xf32>
    %4 = arith.divf %2, %3 : vector<16x1xf32>
    %5 = vector.broadcast %4 : vector<16x1xf32> to vector<16x32xf32>
    %6 = arith.subf %0, %5 : vector<16x32xf32>
    %7 = arith.mulf %6, %6 : vector<16x32xf32>
    %cst_2 = arith.constant dense<0.000000e+00> : vector<16xf32>
    %8 = vector.multi_reduction <add>, %7, %cst_2 [1] : vector<16x32xf32> to vector<16xf32>
    %9 = vector.shape_cast %8 : vector<16xf32> to vector<16x1xf32>
    %cst_3 = arith.constant 3.200000e+01 : f32
    %10 = vector.broadcast %cst_3 : f32 to vector<16x1xf32>
    %11 = arith.divf %9, %10 : vector<16x1xf32>
    %12 = vector.broadcast %4 : vector<16x1xf32> to vector<16x32xf32>
    %13 = arith.subf %0, %12 : vector<16x32xf32>
    %cst_4 = arith.constant 9.99999974E-6 : f32
    %14 = vector.broadcast %cst_4 : f32 to vector<16x1xf32>
    %15 = arith.addf %11, %14 : vector<16x1xf32>
    %16 = math.rsqrt %15 : vector<16x1xf32>
    %17 = vector.broadcast %16 : vector<16x1xf32> to vector<16x32xf32>
    %18 = arith.mulf %13, %17 : vector<16x32xf32>
    %c0_5 = arith.constant 0 : index
    %c0_6 = arith.constant 0 : index
    %19 = vector.load %arg2[%c0_5, %c0_6] : memref<1x32xf32, #tpu.memory_space<vmem>>, vector<1x32xf32>
    %20 = vector.broadcast %19 : vector<1x32xf32> to vector<16x32xf32>
    %21 = arith.mulf %18, %20 : vector<16x32xf32>
    %c0_7 = arith.constant 0 : index
    %c0_8 = arith.constant 0 : index
    %22 = vector.load %arg3[%c0_7, %c0_8] : memref<1x32xf32, #tpu.memory_space<vmem>>, vector<1x32xf32>
    %23 = vector.broadcast %22 : vector<1x32xf32> to vector<16x32xf32>
    %24 = arith.addf %21, %23 : vector<16x32xf32>
    %c0_9 = arith.constant 0 : index
    %c0_10 = arith.constant 0 : index
    %25 = vector.load %arg4[%c0_9, %c0_10] : memref<16x32xf32, #tpu.memory_space<vmem>>, vector<16x32xf32>
    tpu.vector_store %arg4[%c0_9, %c0_10], %24 {strides = array<i32>} : memref<16x32xf32, #tpu.memory_space<vmem>>, vector<16x32xf32>,
    return
  }
  func.func @transform_0(%arg0: i32) -> (i32, i32) {
    %c0_i32 = arith.constant 0 : i32
    %c0_i32_0 = arith.constant 0 : i32
    return %arg0, %c0_i32 : i32, i32
  }
  func.func @transform_1(%arg0: i32) -> (i32, i32) {
    %c0_i32 = arith.constant 0 : i32
    %c0_i32_0 = arith.constant 0 : i32
    %c0_i32_1 = arith.constant 0 : i32
    return %c0_i32, %c0_i32_0 : i32, i32
  }
  func.func @transform_2(%arg0: i32) -> (i32, i32) {
    %c0_i32 = arith.constant 0 : i32
    %c0_i32_0 = arith.constant 0 : i32
    %c0_i32_1 = arith.constant 0 : i32
    return %c0_i32, %c0_i32_0 : i32, i32
  }
  func.func @transform_3(%arg0: i32) -> (i32, i32) {
    %c0_i32 = arith.constant 0 : i32
    %c0_i32_0 = arith.constant 0 : i32
    return %arg0, %c0_i32 : i32, i32
  }
}

</mosaic_0001>

<bundles_post_ra>
// kernel: squeeze.2
= control target key start
LH: loop header
LB: loop body
LE: loop exit
PB: predicated region body
PF: predicated region fallthrough
CT: control target
= control target key end

     0   :  { %vm7_vm0 = vcmask 64512   ;;  %s39_s0 = inlined_call_operand.vmem [shape: f32[16], index: 0, kind: input, shape index: {}]   ;;  %s40_s1 = inlined_call_operand.vmem [shape: f32[2,8], index: 1, kind: output, shape index: {}]  }
   0x1   :  { %v4_v0 = vld [vmem:[%s39_s0] sm:$0x1]  ;;  %s22_s0 = smov 120  }
   0x2   :  { %5 = vst [vmem:[#allocation1] sm:$0x1] %v4_v0 }
   0x9   :  { %v9_v1 = vld [vmem:[#allocation1] sm:$0x1]  }
   0xa   :  { %v6_v2 = vld [vmem:[#allocation1] sm:$0x1]   ;;  %10 = vrot.lane.b32.xlu0 %v9_v1, %s22_s0 }
   0xb   :  { %8 = vst.msk [vmem:[#allocation0] sm:$0x1] %vm7_vm0, %v6_v2  }
  0x7c   :  { %v11_v3 = vpop.permute.xlu0 %10  }
  0x7d   :  { %14 = vst.msk [vmem:[#allocation0 + $0x1] sm:$0x1] %vm7_vm0, %v11_v3  }
  0x84   :  { %v18_v4 = vld [vmem:[#allocation0] sm:$0x3] }
  0x85   :  { %20 = vst [vmem:[%s40_s1] sm:$0x3] %v18_v4 }

// kernel: switch_transformer_forward.7
= control target key start
LH: loop header
LB: loop body
LE: loop exit
PB: predicated region body
PF: predicated region fallthrough
CT: control target
= control target key end

     0   :  { %vm23_vm0 = vcmask 261120   ;;  %v169_v15 = vmov 0.0   ;;  %vm170_vm1 = vmmov 0   ;;  %vm137_vm2 = vcmask 785408   ;;  %s233_s0 = inlined_call_operand.vmem [shape: f32[16,32], index: 0, kind: input, shape index: {}]   ;;  %s234_s3 = inlined_call_operand.vmem [shape: bf16[32,96], index: 3, kind: input, shape index: {}]   ;;  %s235_s1 = inlined_call_operand.vmem [shape: f32[1,32], index: 1, kind: input, shape index: {}]   ;;  %s236_s2 = inlined_call_operand.vmem [shape: f32[1,32], index: 2, kind: input, shape index: {}]   ;;  %s237_s4 = inlined_call_operand.vmem [shape: f32[1,96], index: 4, kind: input, shape index: {}]   ;;  %s238_s5 = inlined_call_operand.vmem [shape: f32[16,96], index: 5, kind: output, shape index: {}]  }
   0x1   :  { %v21_v0 = vld [vmem:[%s233_s0] sm:$0xff]  ;;  %v22_v1 = vld [vmem:[%s233_s0 + $0x8] sm:$0xff]  ;;  %153 = vmatprep.subr.bf16.mxu0 %v169_v15  ;;  %157 = vmatprep.mubr.msk.bf16.mxu0 %vm170_vm1, %v169_v15 }
   0x2   :  { %v24_v2 = vsel %vm23_vm0, %v21_v0, 0.0  ;;  %v27_v3 = vsel %vm23_vm0, %v22_v1, 0.0  ;;  %v163_v14 = vld [vmem:[%s234_s3] sm:$0xff]   ;;  %v164_v16 = vld [vmem:[%s234_s3 + $0x8] sm:$0xff]  }
   0x3   :  { %25 = vadd.xlane.f32.xlu0 %v24_v2  ;;  %154 = vmatpush3.bf16.msra.mxu0 %v163_v14  ;;  %v144_v25 = vld [vmem:[%s235_s1] ss:$0 sm:$0xff] }
   0x4   :  { %155 = vmatprep.subr.bf16.mxu0 %v169_v15  ;;  %v145_v29 = vld [vmem:[%s236_s2] ss:$0 sm:$0xff] }
   0x5   :  { %v146_v34 = vld [vmem:[%s237_s4] ss:$0 sm:$0xff] }
   0x7   :  { %28 = vadd.xlane.f32.xlu0 %v27_v3  ;;  %156 = vmatpush3.bf16.msra.mxu0 %v164_v16 }
  0x90   :  { %v26_v4 = vpop.xlane.xlu0 %25 }
  0x91   :  { %v31_v5 = vmul.f32 0.03125, %v26_v4 }
  0x93   :  { %v33_v6 = vsub.f32 %v21_v0, %v31_v5 }
  0x94   :  { %v29_v7 = vpop.xlane.xlu0 %28 }
  0x95   :  { %v32_v8 = vmul.f32 0.03125, %v29_v7  ;;  %v35_v9 = vmul.f32 %v33_v6, %v33_v6 }
  0x97   :  { %v34_v10 = vsub.f32 %v22_v1, %v32_v8  ;;  %v37_v11 = vsel %vm23_vm0, %v35_v9, 0.0 }
  0x98   :  { %38 = vadd.xlane.f32.xlu1 %v37_v11 }
  0x99   :  { %v36_v12 = vmul.f32 %v34_v10, %v34_v10 }
  0x9b   :  { %v40_v13 = vsel %vm23_vm0, %v36_v12, 0.0 }
  0x9c   :  { %41 = vadd.xlane.f32.xlu1 %v40_v13 }
 0x125   :  { %v39_v17 = vpop.xlane.xlu1 %38 }
 0x126   :  { %v43_v18 = vmul.f32 0.03125, %v39_v17 }
 0x128   :  { %v45_v19 = vadd.f32 1e-05, %v43_v18 }
 0x129   :  { %v42_v20 = vpop.xlane.xlu1 %41 }
 0x12a   :  { %165 = vrsqrt.f32 %v45_v19  ;;  %v44_v21 = vmul.f32 0.03125, %v42_v20 }
 0x12c   :  { %v46_v22 = vadd.f32 1e-05, %v44_v21 }
 0x12e   :  { %167 = vrsqrt.f32 %v46_v22 }
 0x134   :  { %v166_v23 = vpop.eup %165 }
 0x135   :  { %v49_v24 = vmul.f32 %v166_v23, %v33_v6 }
 0x137   :  { %v58_v28 = vmul.f32 %v144_v25, %v49_v24 }
 0x138   :  { %v168_v26 = vpop.eup %167 }
 0x139   :  { %v50_v27 = vmul.f32 %v168_v26, %v34_v10  ;;  %v67_v31 = vadd.f32 %v145_v29, %v58_v28 }
 0x13b   :  { %v59_v30 = vmul.f32 %v144_v25, %v50_v27 }
 0x13d   :  { %v68_v32 = vadd.f32 %v145_v29, %v59_v30 }
 0x13f   :  { %v69_v33 = vpack.c.bf16 %v68_v32, %v67_v31 }
 0x141   :  { %158 = vmatmul.mubr.msk.bf16.vlgmr.msra.gmra.mrb[0].mxu0 %vm23_vm0, %v69_v33 }
 0x214   :  { %v130_v35 = vpop.f32.mrb[0].mxu0 }
 0x215   :  { %v131_v36 = vadd.f32 %v146_v34, %v130_v35  ;;  %v159_v37 = vpop.f32.mrb[1].mxu0 }
 0x216   :  { %v133_v38 = vpop.f32.mrb[2].mxu0 }
 0x217   :  { %138 = vst.msk [vmem:[%s238_s5] sm:$0xff] %vm137_vm2, %v131_v36  ;;  %v134_v39 = vadd.f32 %v146_v34, %v133_v38  ;;  %v160_v40 = vpop.f32.mrb[3].mxu0 }
 0x219   :  { %139 = vst.msk [vmem:[%s238_s5 + $0x8] sm:$0xff] %vm137_vm2, %v134_v39 }

// kernel: switch_transformer_forward.8
= control target key start
LH: loop header
LB: loop body
LE: loop exit
PB: predicated region body
PF: predicated region fallthrough
CT: control target
= control target key end

     0   :  { %s1036_s18 = smov 0   ;;  %s1149_s0 = inlined_call_operand.vmem [shape: f32[16,96], index: 0, kind: input, shape index: {}]   ;;  %s1150_s1 = inlined_call_operand.vmem [shape: f32[8,8], index: 1, kind: input, shape index: {}]   ;;  %s1151_s2 = inlined_call_operand.vmem [shape: bf16[32,32], index: 2, kind: input, shape index: {}]   ;;  %s1152_s3 = inlined_call_operand.vmem [shape: f32[1,32], index: 3, kind: input, shape index: {}]   ;;  %s1153_s4 = inlined_call_operand.vmem [shape: f32[16,32], index: 4, kind: input, shape index: {}]   ;;  %s1154_s5 = inlined_call_operand.vmem [shape: f32[16,32], index: 5, kind: output, shape index: {}]  }
   0x1 LB: > { %s843_s19 = sadd.s32 4294967295, %s988_s18   ;;  %p847_p0 = scmp.ge.s32.totalorder %s988_s18, 1  ;;  %s988_s18 = sphi %s1036_s18, %s15_s18  }
   0x2   : > { %p195_p1 = scmp.lt.s32.totalorder %s988_s18, 3 }
   0x4   : > { %p196_p2 = pnand %p847_p0, %p195_p1 }
   0x5   : > { %p225_p3 = scmp.lt.s32.totalorder (!%p196_p2), %s843_s19, 1  ;;  %v990_v0 = vmov (!%p196_p2), 0.0   ;;  %vm991_vm0 = vmmov (!%p196_p2), 0   ;;  %s992_s24 = smov (!%p196_p2), 96   ;;  %vm244_vm1 = vcmask (!%p196_p2), 64512   ;;  %v1070_v6 = vld [vmem:[%s1150_s1] sm:$0xff] (!%p196_p2) }
   0x6   : > { %199 = sbr.rel (%p196_p2) target bundleno = 1822 (0x71e), region = 40  ;;  %884 = vmatprep.subr.bf16.mxu0 (!%p196_p2), %v990_v0  ;;  %886 = vmatprep.mubr.msk.bf16.mxu0 (!%p196_p2), %vm991_vm0, %v990_v0  ;;  %s993_s25 = smov (!%p196_p2), 64   ;;  %vm310_vm2 = vcmask (!%p196_p2), 1043456   ;;  %vm703_vm3 = vcmask (!%p196_p2), 130048   ;;  %vm705_vm4 = vcmask (!%p196_p2), 195584   ;;  %vm731_vm5 = vcmask (!%p196_p2), 261120  }
   0x7   : > { %890 = vmatprep.subr.bf16.mxu1 (!%p196_p2), %v990_v0  ;;  %892 = vmatprep.mubr.msk.bf16.mxu1 (!%p196_p2), %vm991_vm0, %v990_v0  ;;  %s994_s26 = smov (!%p196_p2), 88   ;;  %s995_s29 = smov (!%p196_p2), 72  }
   0x8   : > { %s996_s30 = smov (!%p196_p2), 120   ;;  %s997_s6 = smov (!%p196_p2), 80  }
   0x9   : > { %s998_s7 = smov (!%p196_p2), 112   ;;  %s999_s8 = smov (!%p196_p2), 104  }
   0xa   : > { %s1000_s9 = smov (!%p196_p2), 56   ;;  %s1001_s10 = smov (!%p196_p2), 48  }
   0xb   : > { %s1002_s11 = smov (!%p196_p2), 40   ;;  %s1003_s12 = smov (!%p196_p2), 8  }
   0xc   : > { %s1004_s17 = smov (!%p196_p2), 16  }
   0xd   : > { %s1156_s19 = smov (!%p225_p3, %s843_s19), 1 }
   0xe   : > { %s1050_s20 = sshll.u32 %s1156_s19, 3  ;;  %s1005_s19 = smov 24  }
   0xf   : > { %s228_s23 = scalar_lea.vmem %s1149_s0, %s1050_s20  ;;  %s236_s28 = scalar_lea.vmem %s1154_s5, %s1050_s20 }
  0x10   : > { %v239_v1 = vld [vmem:[%s228_s23] sm:$0xff]  ;;  %s232_s23 = scalar_lea.vmem %s1153_s4, %s1050_s20 }
  0x11   : > { %v1056_v2 = vpack.c.bf16 %v239_v1, %v239_v1 }
  0x13   : > { %242 = vrot.lane.b32.xlu0 %v1056_v2, %s992_s24  ;;  %305 = vrot.lane.b32.xlu1 %v1056_v2, %s993_s25 }
  0x17   : > { %356 = vrot.lane.b32.xlu1 %v1056_v2, %s994_s26 }
  0x85   : > { %v243_v3 = vpop.permute.xlu0 %242  ;;  %v306_v13 = vpop.permute.xlu1 %305 }
  0x86   : > { %v249_v4 = vsel %vm244_vm1, %v243_v3, 0  ;;  %v312_v14 = vsel %vm310_vm2, %v306_v13, 0 }
  0x87   : > { %885 = vmatpush3.bf16.xpose.msra.mxu0 %v249_v4  ;;  %891 = vmatpush3.bf16.msra.mxu1 %v312_v14 }
  0x88   : > { %902 = vmatprep.subr.bf16.mxu0 %v990_v0  ;;  %896 = vmatprep.subr.bf16.mxu1 %v990_v0 }
  0x89   : > { %v357_v20 = vpop.permute.xlu1 %356 }
  0x8a   : > { %v362_v26 = vsel %vm244_vm1, %v357_v20, 0 }
  0x8e   : > { %887 = vmatmul.mubr.msk.bf16.vlgmr.msra.gmra.mrb[0].mxu0 %vm244_vm1, %v1056_v2 }
  0x8f   : > { %904 = vmatprep.mubr.msk.bf16.mxu0 %vm991_vm0, %v990_v0 }
 0x161   : > { %v285_v5 = vpop.f32.mrb[0].mxu0 }
 0x162   : > { %v291_v7 = vmul.f32 0.35355338, %v285_v5  ;;  %v888_v8 = vpop.f32.mrb[1].mxu0 }
 0x163   : > { %v288_v9 = vpop.f32.mrb[2].mxu0 }
 0x164   : > { %v889_v10 = vpop.f32.mrb[3].mxu0  ;;  %v292_v11 = vadd.f32 %v291_v7, %v1070_v6 }
 0x166   : > { %v293_v12 = vsel %vm244_vm1, %v292_v11, -inf }
 0x167   : > { %294 = vmax.xlane.f32.xlu0 %v293_v12 }
 0x17d   : > { %580 = vrot.lane.b32.xlu0 %v1056_v2, %s995_s29 }
 0x1f4   : > { %v295_v15 = vpop.xlane.xlu0 %294 }
 0x1f5   : > { %v296_v16 = vsub.f32 %v292_v11, %v295_v15 }
 0x1f7   : > { %v297_v17 = vmul.f32 1.442695, %v296_v16 }
 0x1f8   : > { %v581_v29 = vpop.permute.xlu0 %580 }
 0x1f9   : > { %966 = vpow2.f32 %v297_v17  ;;  %v586_v31 = vsel %vm244_vm1, %v581_v29, 0 }
 0x203   : > { %v967_v18 = vpop.eup %966 }
 0x204   : > { %v299_v19 = vsel %vm244_vm1, %v967_v18, 0.0 }
 0x205   : > { %300 = vadd.xlane.f32.xlu1 %v299_v19 }
 0x216   : > { %354 = vrot.lane.b32.xlu1 %v1056_v2, %s996_s30 }
 0x21a   : > { %468 = vrot.lane.b32.xlu1 %v1056_v2, %s997_s6 }
 0x21e   : > { %466 = vrot.lane.b32.xlu1 %v1056_v2, %s998_s7 }
 0x222   : > { %578 = vrot.lane.b32.xlu1 %v1056_v2, %s999_s8 }
 0x292   : > { %v301_v21 = vpop.xlane.xlu1 %300 }
 0x293   : > { %968 = vrcp.f32 %v301_v21 }
 0x296   : > { %v355_v24 = vpop.permute.xlu1 %354 }
 0x29a   : > { %v469_v27 = vpop.permute.xlu1 %468 }
 0x29b   : > { %v474_v28 = vsel %vm244_vm1, %v469_v27, 0 }
 0x29d   : > { %v969_v22 = vpop.eup %968 }
 0x29e   : > { %v303_v23 = vmul.f32 %v969_v22, %v967_v18  ;;  %v467_v30 = vpop.permute.xlu1 %466 }
 0x2a0   : > { %v304_v25 = vpack.c.bf16 %v303_v23, %v303_v23 }
 0x2a2   : > { %893 = vmatmul.mubr.msk.bf16.vlgmr.msra.gmra.mrb[0].mxu1 %vm244_vm1, %v304_v25  ;;  %v579_v32 = vpop.permute.xlu1 %578 }
 0x2a3   : > { %897 = vmatpush3.bf16.xpose.msra.mxu1 %v362_v26  ;;  %898 = vmatprep.mubr.msk.bf16.mxu1 %vm991_vm0, %v990_v0 }
 0x2a4   : > { %908 = vmatprep.subr.bf16.mxu1 %v990_v0 }
 0x2aa   : > { %899 = vmatmul.mubr.msk.bf16.vlgmr.msra.gmra.mrb[4].mxu1 %vm244_vm1, %v355_v24 }
 0x2ab   : > { %909 = vmatpush3.bf16.xpose.msra.mxu1 %v474_v28  ;;  %910 = vmatprep.mubr.msk.bf16.mxu1 %vm991_vm0, %v990_v0 }
 0x2ac   : > { %920 = vmatprep.subr.bf16.mxu1 %v990_v0 }
 0x2b2   : > { %911 = vmatmul.mubr.msk.bf16.vlgmr.msra.gmra.mrb[8].mxu1 %vm244_vm1, %v467_v30 }
 0x2b3   : > { %921 = vmatpush3.bf16.xpose.msra.mxu1 %v586_v31  ;;  %922 = vmatprep.mubr.msk.bf16.mxu1 %vm991_vm0, %v990_v0 }
 0x2b4   : > { %932 = vmatprep.subr.bf16.mxu1 %v990_v0 }
 0x2ba   : > { %923 = vmatmul.mubr.msk.bf16.vlgmr.msra.gmra.mrb[12].mxu1 %vm244_vm1, %v579_v32  ;;  %v964_v32 = vld [vmem:[%s1151_s2] sm:$0xff]  }
 0x2bb   : > { %936 = vmatprep.mubr.msk.bf16.mxu1 %vm991_vm0, %v990_v0  ;;  %933 = vmatpush3.bf16.msra.mxu1 %v964_v32 }
 0x2bc   : > { %934 = vmatprep.subr.bf16.mxu1 %v990_v0 }
 0x375   : > { %v1100_v33 = vpop.f32.mrb[0].mxu1 }
 0x376   : > { %v894_v34 = vpop.f32.mrb[1].mxu1 }
 0x377   : > { %v351_v35 = vpop.f32.mrb[2].mxu1  ;;  %v965_v34 = vld [vmem:[%s1151_s2 + $0x8] sm:$0xff]  }
 0x378   : > { %v895_v36 = vpop.f32.mrb[3].mxu1  ;;  %935 = vmatpush3.bf16.msra.mxu1 %v965_v34 }
 0x37d   : > { %v398_v37 = vpop.f32.mrb[4].mxu1 }
 0x37e   : > { %v404_v38 = vmul.f32 0.35355338, %v398_v37  ;;  %v900_v39 = vpop.f32.mrb[5].mxu1 }
 0x37f   : > { %v401_v40 = vpop.f32.mrb[6].mxu1 }
 0x380   : > { %v901_v41 = vpop.f32.mrb[7].mxu1  ;;  %v405_v42 = vadd.f32 %v404_v38, %v1070_v6 }
 0x382   : > { %v406_v43 = vsel %vm244_vm1, %v405_v42, -inf }
 0x383   : > { %407 = vmax.xlane.f32.xlu1 %v406_v43 }
 0x385   : > { %v510_v44 = vpop.f32.mrb[8].mxu1 }
 0x386   : > { %v516_v45 = vmul.f32 0.35355338, %v510_v44  ;;  %v912_v46 = vpop.f32.mrb[9].mxu1 }
 0x387   : > { %v513_v47 = vpop.f32.mrb[10].mxu1 }
 0x388   : > { %v517_v48 = vadd.f32 %v516_v45, %v1070_v6  ;;  %v913_v49 = vpop.f32.mrb[11].mxu1 }
 0x389   : > { %v859_v49 = vld [vmem:[%s1152_s3] ss:$0 sm:$0xff] }
 0x38a   : > { %v518_v50 = vsel %vm244_vm1, %v517_v48, -inf }
 0x38b   : > { %519 = vmax.xlane.f32.xlu0 %v518_v50 }
 0x38d   : > { %v622_v51 = vpop.f32.mrb[12].mxu1 }
 0x38e   : > { %v628_v52 = vmul.f32 0.35355338, %v622_v51  ;;  %v924_v53 = vpop.f32.mrb[13].mxu1  ;;  %v775_v51 = vld [vmem:[%s232_s23] sm:$0xff] }
 0x38f   : > { %v625_v54 = vpop.f32.mrb[14].mxu1 }
 0x390   : > { %v629_v55 = vadd.f32 %v628_v52, %v1070_v6  ;;  %v925_v56 = vpop.f32.mrb[15].mxu1 }
 0x392   : > { %v630_v57 = vsel %vm244_vm1, %v629_v55, -inf }
 0x393   : > { %631 = vmax.xlane.f32.xlu1 %v630_v57 }
 0x410   : > { %v408_v58 = vpop.xlane.xlu1 %407 }
 0x411   : > { %v409_v59 = vsub.f32 %v405_v42, %v408_v58 }
 0x413   : > { %v410_v60 = vmul.f32 1.442695, %v409_v59 }
 0x415   : > { %970 = vpow2.f32 %v410_v60 }
 0x418   : > { %v520_v6 = vpop.xlane.xlu0 %519 }
 0x419   : > { %v521_v7 = vsub.f32 %v517_v48, %v520_v6 }
 0x41b   : > { %v522_v8 = vmul.f32 1.442695, %v521_v7 }
 0x41f   : > { %v971_v61 = vpop.eup %970 }
 0x420   : > { %v632_v62 = vpop.xlane.xlu1 %631  ;;  %v412_v63 = vsel %vm244_vm1, %v971_v61, 0.0 }
 0x421   : > { %v633_v1 = vsub.f32 %v629_v55, %v632_v62  ;;  %413 = vadd.xlane.f32.xlu1 %v412_v63 }
 0x423   : > { %v634_v3 = vmul.f32 1.442695, %v633_v1 }
 0x425   : > { %972 = vpow2.f32 %v634_v3 }
 0x426   : > { %974 = vpow2.f32 %v522_v8 }
 0x42f   : > { %v973_v4 = vpop.eup %972 }
 0x430   : > { %v636_v5 = vsel %vm244_vm1, %v973_v4, 0.0  ;;  %v975_v9 = vpop.eup %974 }
 0x431   : > { %637 = vadd.xlane.f32.xlu0 %v636_v5  ;;  %v524_v10 = vsel %vm244_vm1, %v975_v9, 0.0 }
 0x432   : > { %418 = vrot.lane.b32.xlu1 %v1056_v2, %s1000_s9 }
 0x447   : > { %530 = vrot.lane.b32.xlu0 %v1056_v2, %s1001_s10 }
 0x456   : > { %525 = vadd.xlane.f32.xlu1 %v524_v10 }
 0x467   : > { %642 = vrot.lane.b32.xlu1 %v1056_v2, %s1002_s11 }
 0x4ae   : > { %v414_v11 = vpop.xlane.xlu1 %413 }
 0x4af   : > { %976 = vrcp.f32 %v414_v11 }
 0x4b2   : > { %v419_v12 = vpop.permute.xlu1 %418 }
 0x4b3   : > { %v424_v13 = vsel %vm310_vm2, %v419_v12, 0 }
 0x4b4   : > { %903 = vmatpush3.bf16.msra.mxu0 %v424_v13 }
 0x4b5   : > { %914 = vmatprep.subr.bf16.mxu0 %v990_v0 }
 0x4b9   : > { %v977_v14 = vpop.eup %976 }
 0x4ba   : > { %v416_v15 = vmul.f32 %v977_v14, %v971_v61 }
 0x4bc   : > { %v417_v16 = vpack.c.bf16 %v416_v15, %v416_v15 }
 0x4be   : > { %905 = vmatmul.mubr.msk.bf16.vlgmr.msra.gmra.mrb[4].mxu0 %vm244_vm1, %v417_v16  ;;  %v638_v17 = vpop.xlane.xlu0 %637 }
 0x4bf   : > { %916 = vmatprep.mubr.msk.bf16.mxu0 %vm991_vm0, %v990_v0 }
 0x4c2   : > { %v531_v18 = vpop.permute.xlu0 %530 }
 0x4c3   : > { %v536_v2 = vsel %vm310_vm2, %v531_v18, 0 }
 0x4c4   : > { %915 = vmatpush3.bf16.msra.mxu0 %v536_v2 }
 0x4c5   : > { %926 = vmatprep.subr.bf16.mxu0 %v990_v0 }
 0x4e3   : > { %v526_v19 = vpop.xlane.xlu1 %525 }
 0x4e4   : > { %978 = vrcp.f32 %v526_v19 }
 0x4e5   : > { %980 = vrcp.f32 %v638_v17 }
 0x4e7   : > { %v643_v21 = vpop.permute.xlu1 %642 }
 0x4e8   : > { %v648_v23 = vsel %vm310_vm2, %v643_v21, 0 }
 0x4ee   : > { %v979_v20 = vpop.eup %978 }
 0x4ef   : > { %v528_v22 = vmul.f32 %v979_v20, %v975_v9  ;;  %v981_v25 = vpop.eup %980 }
 0x4f0   : > { %v640_v26 = vmul.f32 %v981_v25, %v973_v4 }
 0x4f1   : > { %v529_v24 = vpack.c.bf16 %v528_v22, %v528_v22 }
 0x4f2   : > { %v641_v27 = vpack.c.bf16 %v640_v26, %v640_v26 }
 0x4f3   : > { %917 = vmatmul.mubr.msk.bf16.vlgmr.msra.gmra.mrb[8].mxu0 %vm244_vm1, %v529_v24 }
 0x4f4   : > { %927 = vmatpush3.bf16.msra.mxu0 %v648_v23  ;;  %928 = vmatprep.mubr.msk.bf16.mxu0 %vm991_vm0, %v990_v0 }
 0x4fb   : > { %929 = vmatmul.mubr.msk.bf16.vlgmr.msra.gmra.mrb[12].mxu0 %vm244_vm1, %v641_v27 }
 0x591   : > { %v460_v28 = vpop.f32.mrb[4].mxu0 }
 0x592   : > { %691 = vrot.lane.b32.xlu1 %v460_v28, %s1003_s12  ;;  %v906_v29 = vpop.f32.mrb[5].mxu0 }
 0x593   : > { %v463_v30 = vpop.f32.mrb[6].mxu0 }
 0x594   : > { %v907_v31 = vpop.f32.mrb[7].mxu0 }
 0x5c6   : > { %v572_v35 = vpop.f32.mrb[8].mxu0 }
 0x5c7   : > { %695 = vrot.lane.b32.xlu0 %v572_v35, %s1004_s17  ;;  %v918_v36 = vpop.f32.mrb[9].mxu0 }
 0x5c8   : > { %v575_v37 = vpop.f32.mrb[10].mxu0 }
 0x5c9   : > { %v919_v38 = vpop.f32.mrb[11].mxu0 }
 0x5ce   : > { %v684_v39 = vpop.f32.mrb[12].mxu0 }
 0x5cf   : > { %699 = vrot.lane.b32.xlu1 %v684_v39, %s1005_s19  ;;  %v930_v40 = vpop.f32.mrb[13].mxu0 }
 0x5d0   : > { %v687_v41 = vpop.f32.mrb[14].mxu0 }
 0x5d1   : > { %v931_v42 = vpop.f32.mrb[15].mxu0 }
 0x604   : > { %v692_v43 = vpop.permute.xlu1 %691 }
 0x605   : > { %v702_v0 = vsel %vm244_vm1, %v1100_v33, %v692_v43 }
 0x639   : > { %v696_v44 = vpop.permute.xlu0 %695 }
 0x63a   : > { %v704_v45 = vsel %vm703_vm3, %v702_v0, %v696_v44 }
 0x641   : > { %v700_v46 = vpop.permute.xlu1 %699 }
 0x642   : > { %v706_v47 = vsel %vm705_vm4, %v704_v45, %v700_v46 }
 0x643   : > { %v707_v48 = vpack.c.bf16 %v706_v47, %v706_v47 }
 0x645   : > { %937 = vmatmul.mubr.msk.bf16.vlgmr.msra.gmra.mrb[16].mxu1 %vm731_vm5, %v707_v48 }
 0x718   : > { %v769_v50 = vpop.f32.mrb[16].mxu1 }
 0x719   : > { %v770_v52 = vadd.f32 %v859_v49, %v769_v50  ;;  %v938_v53 = vpop.f32.mrb[17].mxu1 }
 0x71a   : > { %v772_v33 = vpop.f32.mrb[18].mxu1 }
 0x71b   : > { %v776_v54 = vadd.f32 %v775_v51, %v770_v52  ;;  %v939_v55 = vpop.f32.mrb[19].mxu1 }
 0x71d   : > { %777 = vst.msk [vmem:[%s236_s28] sm:$0xff] %vm731_vm5, %v776_v54 }
 0x71e PF: > { %s15_s18 = sadd.s32 1, %s988_s18  }
 0x71f   : > { %p12_p4 = scmp.ge.s32.totalorder %s15_s18, 4  }
 0x721   :  { %14 = sbr.rel (!%p12_p4) target bundleno = 1 (0x1), region = 73 }

// kernel: switch_transformer_forward.9
= control target key start
LH: loop header
LB: loop body
LE: loop exit
PB: predicated region body
PF: predicated region fallthrough
CT: control target
= control target key end

     0   :  { %vm43_vm0 = vcmask 261120   ;;  %v662_v15 = vmov 0.0   ;;  %vm663_vm1 = vmmov 0   ;;  %v664_v18 = vmov 0   ;;  %s867_s0 = inlined_call_operand.vmem [shape: f32[16,32], index: 0, kind: input, shape index: {}]   ;;  %s868_s3 = inlined_call_operand.vmem [shape: bf16[32,128], index: 3, kind: input, shape index: {}]   ;;  %s869_s5 = inlined_call_operand.vmem [shape: bf16[32,256], index: 5, kind: input, shape index: {}]   ;;  %s870_s7 = inlined_call_operand.vmem [shape: bf16[256,32], index: 7, kind: input, shape index: {}]   ;;  %s871_s1 = inlined_call_operand.vmem [shape: f32[1,32], index: 1, kind: input, shape index: {}]   ;;  %s872_s2 = inlined_call_operand.vmem [shape: f32[1,32], index: 2, kind: input, shape index: {}]   ;;  %s873_s4 = inlined_call_operand.vmem [shape: f32[1,128], index: 4, kind: input, shape index: {}]   ;;  %s874_s6 = inlined_call_operand.vmem [shape: f32[1,256], index: 6, kind: input, shape index: {}]   ;;  %s875_s11 = inlined_call_operand.vmem [shape: f32[1,1,128], index: 11, kind: output, shape index: {2}]   ;;  %s876_s12 = inlined_call_operand.vmem [shape: f32[16,1], index: 12, kind: output, shape index: {3}]   ;;  %s877_s8 = inlined_call_operand.vmem [shape: f32[1,32], index: 8, kind: input, shape index: {}]   ;;  %s878_s9 = inlined_call_operand.vmem [shape: f32[16,32], index: 9, kind: output, shape index: {0}]   ;;  %s879_s10 = inlined_call_operand.vmem [shape: f32[1,1,128], index: 10, kind: output, shape index: {1}]  }
   0x1   :  { %v733_v0 = vld [vmem:[%s867_s0] sm:$0xff]  ;;  %v738_v1 = vld [vmem:[%s867_s0 + $0x8] sm:$0xff]  ;;  %613 = vmatprep.subr.bf16.mxu1 %v662_v15  ;;  %241 = vst.msk [vmem:[#allocation4] sm:$0xff] %vm43_vm0, %v662_v15  ;;  %242 = vst.msk [vmem:[#allocation4 + $0x8] sm:$0xff] %vm43_vm0, %v662_v15  ;;  %617 = vmatprep.mubr.msk.bf16.mxu1 %vm663_vm1, %v662_v15  ;;  %v180_v56 = vlaneseq  ;;  %vm236_vm2 = vcmask 7168  }
   0x2   :  { %v44_v2 = vsel %vm43_vm0, %v733_v0, 0.0  ;;  %v47_v3 = vsel %vm43_vm0, %v738_v1, 0.0  ;;  %v626_v14 = vld [vmem:[%s868_s3] sm:$0xff]   ;;  %v627_v16 = vld [vmem:[%s868_s3 + $0x8] sm:$0xff]   ;;  %625 = vset.pattern.permute.xlu1 %v664_v18  ;;  %624 = vset.pattern.permute.xlu0 %v664_v18  ;;  %v638_v23 = vld [vmem:[%s870_s7 + $0x50] sm:$0xff]  }
   0x3   :  { %45 = vadd.xlane.f32.xlu0 %v44_v2  ;;  %614 = vmatpush3.bf16.msra.mxu1 %v626_v14  ;;  %v630_v17 = vld [vmem:[%s869_s5 + $0x4] ss:$8 sps:$4 sm:$0xff]   ;;  %v639_v24 = vld [vmem:[%s870_s7 + $0x10] sm:$0xff]   ;;  %v640_v25 = vld [vmem:[%s870_s7 + $0x58] sm:$0xff]   ;;  %v251_v57 = vshrl.u32 %v180_v56, 7 }
   0x4   :  { %615 = vmatprep.subr.bf16.mxu1 %v662_v15  ;;  %v634_v19 = vld [vmem:[%s870_s7 + $0x40] sm:$0xff]   ;;  %v636_v21 = vld [vmem:[%s870_s7 + $0x48] sm:$0xff]   ;;  %v633_v44 = vld [vmem:[%s869_s5 + $0x14] ss:$8 sps:$4 sm:$0xff]  }
   0x5   :  { %v635_v20 = vld [vmem:[%s870_s7] sm:$0xff]   ;;  %591 = vmatprep.subr.bf16.mxu0 %v634_v19  ;;  %v637_v22 = vld [vmem:[%s870_s7 + $0x8] sm:$0xff]   ;;  %v631_v45 = vld [vmem:[%s869_s5 + $0x10] ss:$8 sps:$4 sm:$0xff]   ;;  %v252_v62 = vsub.s32 0, %v251_v57 }
   0x6   :  { %592 = vmatpush3.bf16.msra.mxu0 %v635_v20  ;;  %v558_v34 = vld [vmem:[%s871_s1] ss:$0 sm:$0xff]  ;;  %v641_v47 = vld [vmem:[%s870_s7 + $0x18] sm:$0xff]   ;;  %v644_v50 = vld [vmem:[%s870_s7 + $0x68] sm:$0xff]  }
   0x7   :  { %48 = vadd.xlane.f32.xlu0 %v47_v3  ;;  %616 = vmatpush3.bf16.msra.mxu1 %v627_v16  ;;  %v559_v38 = vld [vmem:[%s872_s2] ss:$0 sm:$0xff]  ;;  %v645_v51 = vld [vmem:[%s870_s7 + $0x28] sm:$0xff]   ;;  %v646_v52 = vld [vmem:[%s870_s7 + $0x70] sm:$0xff]   ;;  %v256_v3 = vsub.s32 1, %v251_v57 }
   0x8   :  { %284 = vmatprep.subr.bf16.mxu1 %v630_v17  ;;  %593 = vmatprep.subr.bf16.mxu0 %v636_v21  ;;  %v628_v42 = vld [vmem:[%s869_s5] ss:$8 sps:$4 sm:$0xff]   ;;  %v647_v53 = vld [vmem:[%s870_s7 + $0x30] sm:$0xff]   ;;  %v648_v54 = vld [vmem:[%s870_s7 + $0x78] sm:$0xff]  }
   0x9   :  { %v642_v48 = vld [vmem:[%s870_s7 + $0x60] sm:$0xff]   ;;  %v649_v55 = vld [vmem:[%s870_s7 + $0x38] sm:$0xff]  }
   0xa   :  { %594 = vmatpush3.bf16.msra.mxu0 %v637_v22  ;;  %v643_v49 = vld [vmem:[%s870_s7 + $0x20] sm:$0xff]  }
   0xb   :  { %595 = vmatprep.subr.bf16.mxu0 %v638_v23  ;;  %v560_v58 = vld [vmem:[%s873_s4] ss:$0 sm:$0xff] }
   0xc   :  { %v248_v2 = vld [vmem:[%s874_s6] sm:$0x3] }
   0xe   :  { %596 = vmatpush3.bf16.msra.mxu0 %v639_v24 }
   0xf   :  { %597 = vmatprep.subr.bf16.mxu0 %v640_v25 }
  0x12   :  { %598 = vmatpush3.bf16.msra.mxu0 %v641_v47 }
  0x13   :  { %599 = vmatprep.subr.bf16.mxu0 %v642_v48 }
  0x16   :  { %600 = vmatpush3.bf16.msra.mxu0 %v643_v49 }
  0x17   :  { %601 = vmatprep.subr.bf16.mxu0 %v644_v50 }
  0x1a   :  { %602 = vmatpush3.bf16.msra.mxu0 %v645_v51 }
  0x1b   :  { %603 = vmatprep.subr.bf16.mxu0 %v646_v52 }
  0x1e   :  { %604 = vmatpush3.bf16.msra.mxu0 %v647_v53 }
  0x1f   :  { %605 = vmatprep.subr.bf16.mxu0 %v648_v54  ;;  %v181_v54 = vand.u32 127, %v180_v56 }
  0x22   :  { %606 = vmatpush3.bf16.msra.mxu0 %v649_v55 }
  0x90   :  { %v46_v4 = vpop.xlane.xlu0 %45 }
  0x91   :  { %v51_v5 = vmul.f32 0.03125, %v46_v4 }
  0x93   :  { %v53_v6 = vsub.f32 %v733_v0, %v51_v5 }
  0x94   :  { %v49_v7 = vpop.xlane.xlu0 %48 }
  0x95   :  { %v52_v8 = vmul.f32 0.03125, %v49_v7  ;;  %v55_v9 = vmul.f32 %v53_v6, %v53_v6  ;;  %v257_v7 = vrot.slane %v248_v2, %v256_v3 }
  0x97   :  { %v54_v10 = vsub.f32 %v738_v1, %v52_v8  ;;  %v57_v11 = vsel %vm43_vm0, %v55_v9, 0.0 }
  0x98   :  { %58 = vadd.xlane.f32.xlu1 %v57_v11 }
  0x99   :  { %v56_v12 = vmul.f32 %v54_v10, %v54_v10 }
  0x9b   :  { %v60_v13 = vsel %vm43_vm0, %v56_v12, 0.0 }
  0x9c   :  { %61 = vadd.xlane.f32.xlu1 %v60_v13 }
 0x125   :  { %v59_v26 = vpop.xlane.xlu1 %58 }
 0x126   :  { %v63_v27 = vmul.f32 0.03125, %v59_v26 }
 0x128   :  { %v65_v28 = vadd.f32 1e-05, %v63_v27 }
 0x129   :  { %v62_v29 = vpop.xlane.xlu1 %61 }
 0x12a   :  { %650 = vrsqrt.f32 %v65_v28  ;;  %v64_v30 = vmul.f32 0.03125, %v62_v29 }
 0x12c   :  { %v66_v31 = vadd.f32 1e-05, %v64_v30 }
 0x12e   :  { %652 = vrsqrt.f32 %v66_v31 }
 0x134   :  { %v651_v32 = vpop.eup %650 }
 0x135   :  { %v69_v33 = vmul.f32 %v651_v32, %v53_v6  ;;  %v253_v6 = vrot.slane %v248_v2, %v252_v62  ;;  %v331_v32 = vld [vmem:[#allocation4] sm:$0xff] }
 0x137   :  { %v78_v37 = vmul.f32 %v558_v34, %v69_v33 }
 0x138   :  { %v653_v35 = vpop.eup %652 }
 0x139   :  { %v70_v36 = vmul.f32 %v653_v35, %v54_v10  ;;  %v87_v40 = vadd.f32 %v559_v38, %v78_v37 }
 0x13b   :  { %v79_v39 = vmul.f32 %v558_v34, %v70_v36  ;;  %v332_v36 = vld [vmem:[#allocation4 + $0x8] sm:$0xff] }
 0x13d   :  { %v88_v41 = vadd.f32 %v559_v38, %v79_v39 }
 0x13f   :  { %v89_v43 = vpack.c.bf16 %v88_v41, %v87_v40 }
 0x141   :  { %90 = vst.msk [vmem:[#allocation2] sm:$0xff] %vm43_vm0, %v89_v43  ;;  %618 = vmatmul.mubr.msk.bf16.vlgmr.msra.gmra.mrb[0].mxu1 %vm43_vm0, %v89_v43 }
 0x142   :  { %285 = vmatpush1.bf16.msra.mxu1 %v628_v42  ;;  %316 = vmatprep.mubr.bf16.mxu1 %v664_v18 }
 0x143   :  { %286 = vmatprep.subr.bf16.mxu1 %v633_v44 }
 0x146   :  { %287 = vmatpush1.bf16.msra.mxu1 %v631_v45 }
 0x148   :  { %v243_v46 = vld [vmem:[#allocation2] sm:$0xff] }
 0x149   :  { %570 = vmatmul.mubr.msk.bf16.vlgmr.msra.gmra.mrb[4].mxu1 %vm43_vm0, %v243_v46 }
 0x214   :  { %v151_v59 = vpop.f32.mrb[0].mxu1 }
 0x215   :  { %v152_v60 = vadd.f32 %v560_v58, %v151_v59  ;;  %v619_v61 = vpop.f32.mrb[1].mxu1 }
 0x216   :  { %v154_v63 = vpop.f32.mrb[2].mxu1 }
 0x217   :  { %v155_v4 = vadd.f32 %v560_v58, %v154_v63  ;;  %158 = vmax.xlane.f32.xlu0 %v152_v60  ;;  %v620_v5 = vpop.f32.mrb[3].mxu1 }
 0x219   :  { %160 = vmax.xlane.f32.xlu1 %v155_v4 }
 0x21c   :  { %v318_v8 = vpop.f32.mrb[4].mxu1 }
 0x21d   :  { %v319_v9 = vadd.f32 %v318_v8, %v253_v6  ;;  %v320_v10 = vpop.f32.mrb[5].mxu1 }
 0x21e   :  { %v321_v11 = vadd.f32 %v320_v10, %v257_v7  ;;  %v322_v12 = vpop.f32.mrb[6].mxu1 }
 0x21f   :  { %v323_v13 = vadd.f32 %v322_v12, %v253_v6  ;;  %v324_v14 = vpop.f32.mrb[7].mxu1  ;;  %v327_v17 = vmax.f32 %v319_v9, 0.0 }
 0x220   :  { %v325_v16 = vadd.f32 %v324_v14, %v257_v7  ;;  %v328_v19 = vmax.f32 %v321_v11, 0.0 }
 0x221   :  { %v329_v18 = vmax.f32 %v323_v13, 0.0 }
 0x222   :  { %v330_v20 = vmax.f32 %v325_v16, 0.0 }
 0x223   :  { %v333_v21 = vpack.c.bf16 %v329_v18, %v327_v17 }
 0x224   :  { %v334_v22 = vpack.c.bf16 %v330_v20, %v328_v19 }
 0x226   :  { %495 = vmatprep.mubr.bf16.mxu0 %v334_v22  ;;  %v587_v22 = vld [vmem:[%s877_s8] ss:$0 sm:$0xff] }
 0x227   :  { %496 = vmatmul.mubr.bf16.vlgmr.msra.gmra.mrb[0].mxu0 %v333_v21 }
 0x2a4   :  { %v159_v23 = vpop.xlane.xlu0 %158 }
 0x2a5   :  { %v162_v24 = vsub.f32 %v152_v60, %v159_v23 }
 0x2a6   :  { %v161_v25 = vpop.xlane.xlu1 %160 }
 0x2a7   :  { %v164_v26 = vmul.f32 1.442695, %v162_v24  ;;  %v163_v27 = vsub.f32 %v155_v4, %v161_v25 }
 0x2a9   :  { %654 = vpow2.f32 %v164_v26  ;;  %v166_v28 = vmul.f32 1.442695, %v163_v27 }
 0x2ab   :  { %656 = vpow2.f32 %v166_v28 }
 0x2b3   :  { %v655_v29 = vpop.eup %654 }
 0x2b4   :  { %168 = vadd.xlane.f32.xlu0 %v655_v29 }
 0x2b5   :  { %v657_v30 = vpop.eup %656 }
 0x2b6   :  { %170 = vadd.xlane.f32.xlu1 %v657_v30 }
 0x2fa   :  { %v607_v31 = vpop.f32.mrb[0].mxu0 }
 0x2fb   :  { %v608_v33 = vpop.f32.mrb[1].mxu0 }
 0x2fc   :  { %v609_v34 = vadd.f32 %v608_v33, %v607_v31  ;;  %v610_v35 = vpop.f32.mrb[2].mxu0 }
 0x2fd   :  { %v611_v37 = vpop.f32.mrb[3].mxu0 }
 0x2fe   :  { %v504_v38 = vadd.f32 %v609_v34, %v331_v32  ;;  %v612_v39 = vadd.f32 %v611_v37, %v610_v35 }
 0x300   :  { %506 = vst.msk [vmem:[#allocation4] sm:$0xff] %vm43_vm0, %v504_v38  ;;  %v505_v40 = vadd.f32 %v612_v39, %v332_v36 }
 0x302   :  { %507 = vst.msk [vmem:[#allocation4 + $0x8] sm:$0xff] %vm43_vm0, %v505_v40 }
 0x307   :  { %v511_v23 = vld [vmem:[#allocation4] sm:$0xff] }
 0x308   :  { %v520_v28 = vadd.f32 %v587_v22, %v511_v23 }
 0x309   :  { %v512_v18 = vld [vmem:[#allocation4 + $0x8] sm:$0xff] }
 0x30a   :  { %v521_v25 = vadd.f32 %v587_v22, %v512_v18 }
 0x341   :  { %v169_v41 = vpop.xlane.xlu0 %168 }
 0x342   :  { %658 = vrcp.f32 %v169_v41 }
 0x343   :  { %v171_v42 = vpop.xlane.xlu1 %170 }
 0x344   :  { %660 = vrcp.f32 %v171_v42 }
 0x34c   :  { %v659_v43 = vpop.eup %658 }
 0x34d   :  { %v173_v44 = vmul.f32 %v659_v43, %v655_v29 }
 0x34e   :  { %v661_v45 = vpop.eup %660 }
 0x34f   :  { %176 = vmax.xlane.f32.xlu0 %v173_v44  ;;  %v175_v46 = vmul.f32 %v661_v45, %v657_v30 }
 0x351   :  { %178 = vmax.xlane.f32.xlu1 %v175_v46  ;;  %v228_v47 = vadd.f32 %v175_v46, %v173_v44 }
 0x353   :  { %v229_v48 = vrot.slane %v228_v47, 4 }
 0x355   :  { %v230_v49 = vadd.f32 %v229_v48, %v228_v47 }
 0x357   :  { %v231_v50 = vrot.slane %v230_v49, 2 }
 0x359   :  { %v232_v51 = vadd.f32 %v231_v50, %v230_v49 }
 0x35b   :  { %v233_v52 = vrot.slane %v232_v51, 1 }
 0x35d   :  { %v234_v53 = vadd.f32 %v233_v52, %v232_v51 }
 0x35f   :  { %235 = vst [vmem:[%s875_s11] sm:$0x1] %v234_v53 }
 0x3dc   :  { %v177_v55 = vpop.xlane.xlu0 %176 }
 0x3dd   :  { %vm182_vm3 = vcmp.ge.f32.partialorder %v173_v44, %v177_v55  ;;  %237 = vst.msk [vmem:[%s876_s12] sm:$0xff] %vm236_vm2, %v177_v55  ;;  %239 = vst.msk [vmem:[#allocation3] sm:$0xff] %vm236_vm2, %v177_v55 }
 0x3de   :  { %v179_v57 = vpop.xlane.xlu1 %178  ;;  %v184_v58 = vsel %vm182_vm3, %v181_v54, 128 }
 0x3df   :  { %vm183_vm4 = vcmp.ge.f32.partialorder %v175_v46, %v179_v57  ;;  %238 = vst.msk [vmem:[%s876_s12 + $0x8] sm:$0xff] %vm236_vm2, %v179_v57  ;;  %240 = vst.msk [vmem:[#allocation3 + $0x8] sm:$0xff] %vm236_vm2, %v179_v57  ;;  %v187_v59 = vshra.s32 %v184_v58, 16  ;;  %v186_v63 = vand.u32 65535, %v184_v58 }
 0x3e0   :  { %v185_v60 = vsel %vm183_vm4, %v181_v54, 128 }
 0x3e1   :  { %v189_v61 = vcvt.s32.f32 %v187_v59  ;;  %v201_v56 = vshra.s32 %v185_v60, 16  ;;  %v200_v2 = vand.u32 65535, %v185_v60  ;;  %v188_v4 = vcvt.s32.f32 %v186_v63 }
 0x3e3   :  { %190 = vmin.xlane.f32.xlu0 %v189_v61  ;;  %v203_v62 = vcvt.s32.f32 %v201_v56  ;;  %v202_v7 = vcvt.s32.f32 %v200_v2 }
 0x3e4   :  { %v524_v10 = vld [vmem:[#allocation3] sm:$0xff] }
 0x3e5   :  { %204 = vmin.xlane.f32.xlu1 %v203_v62 }
 0x3e6   :  { %v525_v9 = vld [vmem:[#allocation3 + $0x8] sm:$0xff] }
 0x470   :  { %v191_v3 = vpop.xlane.xlu0 %190 }
 0x471   :  { %vm192_vm5 = vcmp.eq.f32.partialorder %v189_v61, %v191_v3  ;;  %v197_v11 = vcvt.f32.s32 %v191_v3 }
 0x472   :  { %v205_v5 = vpop.xlane.xlu1 %204  ;;  %v193_v6 = vsel %vm192_vm5, %v188_v4, inf }
 0x473   :  { %194 = vmin.xlane.f32.xlu0 %v193_v6  ;;  %vm206_vm6 = vcmp.eq.f32.partialorder %v203_v62, %v205_v5  ;;  %v211_v12 = vcvt.f32.s32 %v205_v5  ;;  %v198_v14 = vshll.u32 %v197_v11, 16 }
 0x474   :  { %v207_v8 = vsel %vm206_vm6, %v202_v7, inf }
 0x475   :  { %208 = vmin.xlane.f32.xlu1 %v207_v8  ;;  %v212_v19 = vshll.u32 %v211_v12, 16 }
 0x486   :  { %533 = vperm.xlu1 %625, %v525_v9  }
 0x489   :  { %528 = vperm.xlu0 %624, %v524_v10  }
 0x500   :  { %v195_v13 = vpop.xlane.xlu0 %194 }
 0x501   :  { %v196_v16 = vcvt.f32.s32 %v195_v13 }
 0x502   :  { %v209_v17 = vpop.xlane.xlu1 %208 }
 0x503   :  { %v199_v20 = vadd.s32 %v198_v14, %v196_v16  ;;  %v210_v21 = vcvt.f32.s32 %v209_v17 }
 0x505   :  { %vm214_vm7 = vcmp.eq.s32.totalorder %v181_v54, %v199_v20  ;;  %v213_v24 = vadd.s32 %v212_v19, %v210_v21 }
 0x506   :  { %v534_v26 = vpop.permute.xlu1 %533  ;;  %v564_v29 = vsel %vm214_vm7, 1.0, %v662_v15 }
 0x507   :  { %vm215_vm8 = vcmp.eq.s32.totalorder %v181_v54, %v213_v24  ;;  %v537_v27 = vmul.f32 %v534_v26, %v521_v25 }
 0x508   :  { %v565_v30 = vsel %vm215_vm8, 1.0, %v662_v15  ;;  %v529_v31 = vpop.permute.xlu0 %528 }
 0x509   :  { %v220_v32 = vadd.f32 %v565_v30, %v564_v29  ;;  %v539_v33 = vadd.f32 %v537_v27, %v738_v1  ;;  %v536_v34 = vmul.f32 %v529_v31, %v520_v28 }
 0x50b   :  { %v221_v35 = vrot.slane %v220_v32, 4  ;;  %541 = vst.msk [vmem:[%s878_s9 + $0x8] sm:$0xff] %vm43_vm0, %v539_v33  ;;  %v538_v36 = vadd.f32 %v536_v34, %v733_v0 }
 0x50d   :  { %v222_v37 = vadd.f32 %v221_v35, %v220_v32  ;;  %540 = vst.msk [vmem:[%s878_s9] sm:$0xff] %vm43_vm0, %v538_v36 }
 0x50f   :  { %v223_v15 = vrot.slane %v222_v37, 2 }
 0x511   :  { %v224_v38 = vadd.f32 %v223_v15, %v222_v37 }
 0x513   :  { %v225_v39 = vrot.slane %v224_v38, 1 }
 0x515   :  { %v226_v40 = vadd.f32 %v225_v39, %v224_v38 }
 0x517   :  { %227 = vst [vmem:[%s879_s10] sm:$0x1] %v226_v40 }

// kernel: switch_transformer_forward.13
= control target key start
LH: loop header
LB: loop body
LE: loop exit
PB: predicated region body
PF: predicated region fallthrough
CT: control target
= control target key end

     0   :  { %vm16_vm0 = vcmask 261120   ;;  %s118_s0 = inlined_call_operand.vmem [shape: f32[16,32], index: 0, kind: input, shape index: {}]   ;;  %s119_s1 = inlined_call_operand.vmem [shape: f32[1,32], index: 1, kind: input, shape index: {}]   ;;  %s120_s2 = inlined_call_operand.vmem [shape: f32[1,32], index: 2, kind: input, shape index: {}]   ;;  %s121_s3 = inlined_call_operand.vmem [shape: f32[16,32], index: 3, kind: output, shape index: {}]  }
   0x1   :  { %v14_v0 = vld [vmem:[%s118_s0] sm:$0xff]  ;;  %v15_v1 = vld [vmem:[%s118_s0 + $0x8] sm:$0xff] }
   0x2   :  { %v17_v2 = vsel %vm16_vm0, %v14_v0, 0.0  ;;  %v20_v3 = vsel %vm16_vm0, %v15_v1, 0.0  ;;  %v68_v21 = vld [vmem:[%s119_s1] ss:$0 sm:$0xff] }
   0x3   :  { %18 = vadd.xlane.f32.xlu0 %v17_v2  ;;  %v69_v23 = vld [vmem:[%s120_s2] ss:$0 sm:$0xff] }
   0x7   :  { %21 = vadd.xlane.f32.xlu0 %v20_v3 }
  0x90   :  { %v19_v4 = vpop.xlane.xlu0 %18 }
  0x91   :  { %v24_v5 = vmul.f32 0.03125, %v19_v4 }
  0x93   :  { %v26_v6 = vsub.f32 %v14_v0, %v24_v5 }
  0x94   :  { %v22_v7 = vpop.xlane.xlu0 %21 }
  0x95   :  { %v25_v8 = vmul.f32 0.03125, %v22_v7  ;;  %v28_v9 = vmul.f32 %v26_v6, %v26_v6 }
  0x97   :  { %v27_v10 = vsub.f32 %v15_v1, %v25_v8  ;;  %v30_v11 = vsel %vm16_vm0, %v28_v9, 0.0 }
  0x98   :  { %31 = vadd.xlane.f32.xlu1 %v30_v11 }
  0x99   :  { %v29_v12 = vmul.f32 %v27_v10, %v27_v10 }
  0x9b   :  { %v33_v13 = vsel %vm16_vm0, %v29_v12, 0.0 }
  0x9c   :  { %34 = vadd.xlane.f32.xlu1 %v33_v13 }
 0x125   :  { %v32_v14 = vpop.xlane.xlu1 %31 }
 0x126   :  { %v36_v15 = vmul.f32 0.03125, %v32_v14 }
 0x128   :  { %v38_v16 = vadd.f32 1e-05, %v36_v15 }
 0x129   :  { %v35_v17 = vpop.xlane.xlu1 %34 }
 0x12a   :  { %70 = vrsqrt.f32 %v38_v16  ;;  %v37_v18 = vmul.f32 0.03125, %v35_v17 }
 0x12c   :  { %v39_v19 = vadd.f32 1e-05, %v37_v18 }
 0x12e   :  { %72 = vrsqrt.f32 %v39_v19 }
 0x134   :  { %v71_v20 = vpop.eup %70 }
 0x135   :  { %v42_v22 = vmul.f32 %v71_v20, %v26_v6 }
 0x137   :  { %v51_v24 = vmul.f32 %v68_v21, %v42_v22 }
 0x138   :  { %v73_v25 = vpop.eup %72 }
 0x139   :  { %v60_v26 = vadd.f32 %v69_v23, %v51_v24  ;;  %v43_v27 = vmul.f32 %v73_v25, %v27_v10 }
 0x13b   :  { %62 = vst.msk [vmem:[%s121_s3] sm:$0xff] %vm16_vm0, %v60_v26  ;;  %v52_v28 = vmul.f32 %v68_v21, %v43_v27 }
 0x13d   :  { %v61_v29 = vadd.f32 %v69_v23, %v52_v28 }
 0x13f   :  { %63 = vst.msk [vmem:[%s121_s3 + $0x8] sm:$0xff] %vm16_vm0, %v61_v29 }

</bundles_post_ra>
